<compile_context>
chip_gen: v7x
topology: tpu7x:2x2x1
jax: 0.10.0
libtpu: 0.0.40
codegen_flags: <defaults>
</compile_context>

<pallas_src>
import jax
import jax.numpy as jnp
import numpy as np
from jax.experimental import pallas as pl
from jax.experimental.pallas import tpu as pltpu


# ----------------------------------------------------------------------------
# Kernel
# ----------------------------------------------------------------------------
def nfm_cl_kernel(x_ref, dcs_ref, idcs_ref, wa_ref, wb_ref,
                  win_ref, bin_ref, w1_ref, b1_ref, w2_ref, b2_ref,
                  wcls_ref, bcls_ref, out_ref):
    f32 = jnp.float32
    bf16 = jnp.bfloat16

    x = x_ref[...]                                   # (TB, L, Cp) f32
    tb, L, cp = x.shape
    hp = win_ref.shape[1]                            # padded hidden width
    fp = wa_ref.shape[0] // 2                        # padded rFFT length

    # hyper_vars.input_: RevIN-style per-channel instance standardization.
    # TODO(synk): exact hyper_vars.input_ semantics unavailable; instance
    # standardization assumed (one-pass variance).
    mu = jnp.mean(x, axis=1, keepdims=True)
    var = jnp.mean(x * x, axis=1, keepdims=True) - mu * mu
    xn = (x - mu) * jax.lax.rsqrt(var + 1e-5)

    # Channel embedding C -> H on TB*L rows (fills MXU, bf16 operands).
    h2 = jnp.dot(xn.reshape(tb * L, cp).astype(bf16), win_ref[...],
                 preferred_element_type=f32) + bin_ref[...]
    h = h2.reshape(tb, L, hp)                        # (TB, L, Hp) f32

    # Forward real DFT, cos/sin halves fused into one stacked batched matmul.
    dcs = jnp.broadcast_to(dcs_ref[...], (tb,) + dcs_ref.shape)   # (TB, 2Fp, L)
    X = jax.lax.dot_general(dcs, h.astype(bf16),
                            dimension_numbers=(((2,), (1,)), ((0,), (0,))),
                            preferred_element_type=f32)           # (TB, 2Fp, Hp)

    # Learnable complex spectral filter with pre-concatenated weights:
    #   Y = [yr; yi] = X * [Wr; Wr] + [xi; xr] * [-Wi; Wi]   (f32 on the VPU)
    xsw = jnp.concatenate([X[:, fp:, :], X[:, :fp, :]], axis=1)   # [xi; xr]
    Y = X * wa_ref[...] + xsw * wb_ref[...]                       # (TB, 2Fp, Hp)

    # Inverse real DFT, fused into one stacked batched matmul.
    idcs = jnp.broadcast_to(idcs_ref[...], (tb,) + idcs_ref.shape)  # (TB, L, 2Fp)
    hf = jax.lax.dot_general(idcs, Y.astype(bf16),
                             dimension_numbers=(((2,), (1,)), ((0,), (0,))),
                             preferred_element_type=f32)            # (TB, L, Hp)

    z = h + hf                                        # residual, (TB, L, Hp)

    # Feed-forward with GELU.  Only the GELU output needs the full length L;
    # the second linear commutes with AVG pooling, so it runs on TB rows only.
    g = jax.nn.gelu(jnp.dot(z.reshape(tb * L, hp).astype(bf16), w1_ref[...],
                            preferred_element_type=f32) + b1_ref[...])
    pooled_z = jnp.mean(z, axis=1)                    # (TB, Hp)
    pooled_g = jnp.mean(g.reshape(tb, L, hp), axis=1)  # (TB, Hp)
    pooled = pooled_z + jnp.dot(pooled_g.astype(bf16), w2_ref[...],
                                preferred_element_type=f32) + b2_ref[...]

    # Classifier: pooling_method='AVG', processing='mean' -> lane-dense head.
    logits = jnp.dot(pooled.astype(bf16), wcls_ref[...],
                     preferred_element_type=f32) + bcls_ref[...]    # (TB, NCp)
    out_ref[0] = logits


# ----------------------------------------------------------------------------
# Parameter / DFT-matrix construction
# ----------------------------------------------------------------------------
def round_up(n, m):
    return ((n + m - 1) // m) * m


def make_dft_mats(L):
    """Forward/inverse real-DFT matrices (numpy f32, logical shapes)."""
    n = np.arange(L)
    F = L // 2 + 1
    k = np.arange(F)
    theta = 2.0 * np.pi * np.outer(k, n) / L                 # (F, L)
    Dc = np.cos(theta)                                       # forward real
    Ds = -np.sin(theta)                                      # forward imag (rfft)
    alpha = np.full((F,), 2.0 / L)
    alpha[0] = 1.0 / L
    if L % 2 == 0:
        alpha[-1] = 1.0 / L
    IDc = alpha[None, :] * np.cos(theta.T)                   # (L, F)
    IDs = -alpha[None, :] * np.sin(theta.T)                  # (L, F)
    return (Dc.astype(np.float32), Ds.astype(np.float32),
            IDc.astype(np.float32), IDs.astype(np.float32))


def init_master_params(key, C, H, F, NC):
    """Un-padded f32 master parameters (logical shapes)."""
    ks = jax.random.split(key, 6)
    s = lambda fan_in: 1.0 / np.sqrt(fan_in)
    return dict(
        Wr=jnp.ones((F, H), jnp.float32)
           + 0.02 * jax.random.normal(ks[0], (F, H), jnp.float32),
        Wi=0.02 * jax.random.normal(ks[1], (F, H), jnp.float32),
        Win=s(C) * jax.random.normal(ks[2], (C, H), jnp.float32),
        bin=jnp.zeros((1, H), jnp.float32),
        W1=s(H) * jax.random.normal(ks[3], (H, H), jnp.float32),
        b1=jnp.zeros((1, H), jnp.float32),
        W2=s(H) * jax.random.normal(ks[4], (H, H), jnp.float32),
        b2=jnp.zeros((1, H), jnp.float32),
        Wcls=s(H) * jax.random.normal(ks[5], (H, NC), jnp.float32),
        bcls=jnp.zeros((1, NC), jnp.float32),
    )


def _pad2(a, rows, cols):
    a = jnp.asarray(a)
    return jnp.pad(a, ((0, rows - a.shape[0]), (0, cols - a.shape[1])))


def make_kernel_params(master, dft, L, C, H, F, NC):
    """Zero-pad to lane/sublane-friendly shapes; bf16 for MXU-only operands."""
    bf16, f32 = jnp.bfloat16, jnp.float32
    Cp = round_up(C, 8)
    Hp = round_up(H, 128)
    NCp = round_up(NC, 128)
    Fp = round_up(F, 8)

    Dc, Ds, IDc, IDs = dft
    Dcs = jnp.concatenate([_pad2(Dc, Fp, L), _pad2(Ds, Fp, L)], axis=0)     # (2Fp, L)
    IDcs = jnp.concatenate([_pad2(IDc, L, Fp), _pad2(IDs, L, Fp)], axis=1)  # (L, 2Fp)

    Wr = _pad2(master["Wr"], Fp, Hp)       # padded with ZEROS
    Wi = _pad2(master["Wi"], Fp, Hp)
    Wa = jnp.concatenate([Wr, Wr], axis=0).astype(f32)      # (2Fp, Hp)
    Wb = jnp.concatenate([-Wi, Wi], axis=0).astype(f32)     # (2Fp, Hp)

    return dict(
        Dcs=Dcs.astype(bf16),
        IDcs=IDcs.astype(bf16),
        Wa=Wa,
        Wb=Wb,
        Win=_pad2(master["Win"], Cp, Hp).astype(bf16),
        bin=_pad2(master["bin"], 1, Hp).astype(f32),
        W1=_pad2(master["W1"], Hp, Hp).astype(bf16),
        b1=_pad2(master["b1"], 1, Hp).astype(f32),
        W2=_pad2(master["W2"], Hp, Hp).astype(bf16),
        b2=_pad2(master["b2"], 1, Hp).astype(f32),
        Wcls=_pad2(master["Wcls"], Hp, NCp).astype(bf16),
        bcls=_pad2(master["bcls"], 1, NCp).astype(f32),
    )


# ----------------------------------------------------------------------------
# Wrapper
# ----------------------------------------------------------------------------
def nfm_cl_forward(x, kp, n_classes, tb=None):
    B, L, C = x.shape
    Cp = kp["Win"].shape[0]
    Hp = kp["Win"].shape[1]
    NCp = kp["Wcls"].shape[1]
    F2p = kp["Dcs"].shape[0]

    if tb is None:
        # ~512 rows (tb*L) per step to fill the MXU, but keep the grid >= 2
        # so both v7x TensorCores get work when B allows it.
        tb = max(1, min(pl.cdiv(B, 2), max(1, 512 // L)))
    nblk = pl.cdiv(B, tb)
    Bp = nblk * tb

    # Zero-pad batch (to a multiple of TB) and channels (to Cp).
    xp = jnp.zeros((Bp, L, Cp), jnp.float32).at[:B, :, :C].set(x)

    def const(shape):
        return pl.BlockSpec(shape, lambda b: (0,) * len(shape))

    out = pl.pallas_call(
        nfm_cl_kernel,
        out_shape=jax.ShapeDtypeStruct((nblk, tb, NCp), jnp.float32),
        grid=(nblk,),
        in_specs=[
            pl.BlockSpec((tb, L, Cp), lambda b: (b, 0, 0)),   # x
            const((F2p, L)),            # Dcs  (bf16)
            const((L, F2p)),            # IDcs (bf16)
            const((F2p, Hp)),           # Wa   (f32)
            const((F2p, Hp)),           # Wb   (f32)
            const((Cp, Hp)),            # Win  (bf16)
            const((1, Hp)),             # bin
            const((Hp, Hp)),            # W1   (bf16)
            const((1, Hp)),             # b1
            const((Hp, Hp)),            # W2   (bf16)
            const((1, Hp)),             # b2
            const((Hp, NCp)),           # Wcls (bf16)
            const((1, NCp)),            # bcls
        ],
        out_specs=pl.BlockSpec((1, tb, NCp), lambda b: (b, 0, 0)),
        compiler_params=pltpu.CompilerParams(
            dimension_semantics=("parallel",),
            vmem_limit_bytes=32 * 1024 * 1024),
    )(xp, kp["Dcs"], kp["IDcs"], kp["Wa"], kp["Wb"],
      kp["Win"], kp["bin"], kp["W1"], kp["b1"], kp["W2"], kp["b2"],
      kp["Wcls"], kp["bcls"])

    return out.reshape(Bp, NCp)[:B, :n_classes]


# ----------------------------------------------------------------------------
# References
# ----------------------------------------------------------------------------
def nfm_cl_mirror(x, kp):
    """Pure-JAX mirror of the kernel math (same padded bf16 operands)."""
    bf16, f32 = jnp.bfloat16, jnp.float32
    Cp = kp["Win"].shape[0]
    Hp = kp["Win"].shape[1]
    Fp = kp["Wa"].shape[0] // 2
    B, L, C = x.shape
    xp = jnp.pad(x, ((0, 0), (0, 0), (0, Cp - C)))

    mu = jnp.mean(xp, axis=1, keepdims=True)
    var = jnp.mean(xp * xp, axis=1, keepdims=True) - mu * mu
    xn = (xp - mu) * jax.lax.rsqrt(var + 1e-5)

    h = (jnp.dot(xn.reshape(B * L, Cp).astype(bf16), kp["Win"],
                 preferred_element_type=f32) + kp["bin"]).reshape(B, L, Hp)
    X = jnp.einsum('fl,blh->bfh', kp["Dcs"], h.astype(bf16),
                   preferred_element_type=f32)
    Xsw = jnp.concatenate([X[:, Fp:], X[:, :Fp]], axis=1)
    Y = X * kp["Wa"] + Xsw * kp["Wb"]
    hf = jnp.einsum('lf,bfh->blh', kp["IDcs"], Y.astype(bf16),
                    preferred_element_type=f32)
    z = h + hf
    g = jax.nn.gelu(jnp.dot(z.reshape(B * L, Hp).astype(bf16), kp["W1"],
                            preferred_element_type=f32) + kp["b1"])
    pooled = (jnp.mean(z, axis=1)
              + jnp.dot(jnp.mean(g.reshape(B, L, Hp), axis=1).astype(bf16),
                        kp["W2"], preferred_element_type=f32) + kp["b2"])
    return jnp.dot(pooled.astype(bf16), kp["Wcls"],
                   preferred_element_type=f32) + kp["bcls"]


def nfm_cl_fft_ref(x, mp):
    """f32 / jnp.fft semantic reference (un-padded master params)."""
    L = x.shape[1]
    mu = x.mean(axis=1, keepdims=True)
    var = (x * x).mean(axis=1, keepdims=True) - mu * mu
    xn = (x - mu) / jnp.sqrt(var + 1e-5)
    h = xn @ mp["Win"] + mp["bin"]
    X = jnp.fft.rfft(h, axis=1)
    Y = X * (mp["Wr"] + 1j * mp["Wi"])[None]
    hf = jnp.fft.irfft(Y, n=L, axis=1)
    z = h + hf
    ff = jax.nn.gelu(z @ mp["W1"] + mp["b1"]) @ mp["W2"] + mp["b2"]
    z = z + ff
    pooled = z.mean(axis=1)
    return pooled @ mp["Wcls"] + mp["bcls"]


# ----------------------------------------------------------------------------
if __name__ == "__main__":
    B, L, C = 8, 16, 4        # batch, sequence length, input channels
    H, NC = 32, 4             # hidden width, number of classes
    F = L // 2 + 1

    key = jax.random.PRNGKey(0)
    k_x, k_p = jax.random.split(key)
    x = jax.random.normal(k_x, (B, L, C), jnp.float32)

    master = init_master_params(k_p, C, H, F, NC)
    dft = make_dft_mats(L)
    kp = make_kernel_params(master, dft, L, C, H, F, NC)

    logits = jax.block_until_ready(nfm_cl_forward(x, kp, NC))

    # Tight check: same (padded, bf16-matmul) math executed by XLA.
    mirror = jax.block_until_ready(nfm_cl_mirror(x, kp))[:, :NC]
    np.testing.assert_allclose(np.asarray(logits), np.asarray(mirror),
                               rtol=5e-3, atol=5e-3)

    # Loose semantic check: f32 jnp.fft reference (bf16 MXU rounding allowed).
    ref = jax.block_until_ready(nfm_cl_fft_ref(x, master))
    np.testing.assert_allclose(np.asarray(logits), np.asarray(ref),
                               rtol=1e-1, atol=1.5e-1)

    print("KERNEL_OK")
</pallas_src>

<mosaic_0001>
module attributes {stable_mosaic.version = 11 : i64} {
  func.func @nfm_cl_kernel(%arg0: i32, %arg1: memref<4x16x8xf32, #tpu.memory_space<vmem>>, %arg2: memref<32x16xbf16, #tpu.memory_space<vmem>>, %arg3: memref<16x32xbf16, #tpu.memory_space<vmem>>, %arg4: memref<32x128xf32, #tpu.memory_space<vmem>>, %arg5: memref<32x128xf32, #tpu.memory_space<vmem>>, %arg6: memref<8x128xbf16, #tpu.memory_space<vmem>>, %arg7: memref<1x128xf32, #tpu.memory_space<vmem>>, %arg8: memref<128x128xbf16, #tpu.memory_space<vmem>>, %arg9: memref<1x128xf32, #tpu.memory_space<vmem>>, %arg10: memref<128x128xbf16, #tpu.memory_space<vmem>>, %arg11: memref<1x128xf32, #tpu.memory_space<vmem>>, %arg12: memref<128x128xbf16, #tpu.memory_space<vmem>>, %arg13: memref<1x128xf32, #tpu.memory_space<vmem>>, %arg14: memref<1x4x128xf32, #tpu.memory_space<vmem>>) attributes {dimension_semantics = [#tpu.dimension_semantics<parallel>], iteration_bounds = array<i64: 2>, scalar_prefetch = 0 : i64, scratch_operands = 0 : i64, tpu.core_type = #tpu.core_type<tc>, window_params = [{transform_indices = @transform_0, window_bounds = array<i64: 4, 16, 8>}, {pipeline_mode = #tpu.pipeline_mode<synchronous>, transform_indices = @transform_1, window_bounds = array<i64: 32, 16>}, {pipeline_mode = #tpu.pipeline_mode<synchronous>, transform_indices = @transform_2, window_bounds = array<i64: 16, 32>}, {pipeline_mode = #tpu.pipeline_mode<synchronous>, transform_indices = @transform_3, window_bounds = array<i64: 32, 128>}, {pipeline_mode = #tpu.pipeline_mode<synchronous>, transform_indices = @transform_4, window_bounds = array<i64: 32, 128>}, {pipeline_mode = #tpu.pipeline_mode<synchronous>, transform_indices = @transform_5, window_bounds = array<i64: 8, 128>}, {pipeline_mode = #tpu.pipeline_mode<synchronous>, transform_indices = @transform_6, window_bounds = array<i64: 1, 128>}, {pipeline_mode = #tpu.pipeline_mode<synchronous>, transform_indices = @transform_7, window_bounds = array<i64: 128, 128>}, {pipeline_mode = #tpu.pipeline_mode<synchronous>, transform_indices = @transform_8, window_bounds = array<i64: 1, 128>}, {pipeline_mode = #tpu.pipeline_mode<synchronous>, transform_indices = @transform_9, window_bounds = array<i64: 128, 128>}, {pipeline_mode = #tpu.pipeline_mode<synchronous>, transform_indices = @transform_10, window_bounds = array<i64: 1, 128>}, {pipeline_mode = #tpu.pipeline_mode<synchronous>, transform_indices = @transform_11, window_bounds = array<i64: 128, 128>}, {pipeline_mode = #tpu.pipeline_mode<synchronous>, transform_indices = @transform_12, window_bounds = array<i64: 1, 128>}, {transform_indices = @transform_13, window_bounds = array<i64: 1, 4, 128>}]} {
    %c0 = arith.constant 0 : index
    %c0_0 = arith.constant 0 : index
    %c0_1 = arith.constant 0 : index
    %0 = vector.load %arg1[%c0, %c0_0, %c0_1] : memref<4x16x8xf32, #tpu.memory_space<vmem>>, vector<4x16x8xf32>
    %cst = arith.constant dense<0.000000e+00> : vector<4x8xf32>
    %1 = vector.multi_reduction <add>, %0, %cst [1] : vector<4x16x8xf32> to vector<4x8xf32>
    %2 = vector.shape_cast %1 : vector<4x8xf32> to vector<4x1x8xf32>
    %cst_2 = arith.constant 1.600000e+01 : f32
    %3 = vector.broadcast %cst_2 : f32 to vector<4x1x8xf32>
    %4 = arith.divf %2, %3 : vector<4x1x8xf32>
    %5 = arith.mulf %0, %0 : vector<4x16x8xf32>
    %cst_3 = arith.constant dense<0.000000e+00> : vector<4x8xf32>
    %6 = vector.multi_reduction <add>, %5, %cst_3 [1] : vector<4x16x8xf32> to vector<4x8xf32>
    %7 = vector.shape_cast %6 : vector<4x8xf32> to vector<4x1x8xf32>
    %cst_4 = arith.constant 1.600000e+01 : f32
    %8 = vector.broadcast %cst_4 : f32 to vector<4x1x8xf32>
    %9 = arith.divf %7, %8 : vector<4x1x8xf32>
    %10 = arith.mulf %4, %4 : vector<4x1x8xf32>
    %11 = arith.subf %9, %10 : vector<4x1x8xf32>
    %12 = vector.broadcast %4 : vector<4x1x8xf32> to vector<4x16x8xf32>
    %13 = arith.subf %0, %12 : vector<4x16x8xf32>
    %cst_5 = arith.constant 9.99999974E-6 : f32
    %14 = vector.broadcast %cst_5 : f32 to vector<4x1x8xf32>
    %15 = arith.addf %11, %14 : vector<4x1x8xf32>
    %16 = math.rsqrt %15 : vector<4x1x8xf32>
    %17 = vector.broadcast %16 : vector<4x1x8xf32> to vector<4x16x8xf32>
    %18 = arith.mulf %13, %17 : vector<4x16x8xf32>
    %19 = vector.shape_cast %18 : vector<4x16x8xf32> to vector<64x8xf32>
    %20 = arith.truncf %19 : vector<64x8xf32> to vector<64x8xbf16>
    %c0_6 = arith.constant 0 : index
    %c0_7 = arith.constant 0 : index
    %21 = vector.load %arg6[%c0_6, %c0_7] : memref<8x128xbf16, #tpu.memory_space<vmem>>, vector<8x128xbf16>
    %cst_8 = arith.constant dense<0.000000e+00> : vector<64x128xf32>
    %22 = tpu.matmul %20, %21, %cst_8 {dimension_numbers = #tpu.dot_dimension_numbers<[1], [0], [0], [1], [0, 0, 1, 1], [], []>} : vector<64x8xbf16>, vector<8x128xbf16>, vector<64x128xf32> -> vector<64x128xf32>
    %c0_9 = arith.constant 0 : index
    %c0_10 = arith.constant 0 : index
    %23 = vector.load %arg7[%c0_9, %c0_10] : memref<1x128xf32, #tpu.memory_space<vmem>>, vector<1x128xf32>
    %24 = vector.broadcast %23 : vector<1x128xf32> to vector<64x128xf32>
    %25 = arith.addf %22, %24 : vector<64x128xf32>
    %26 = vector.shape_cast %25 : vector<64x128xf32> to vector<4x16x128xf32>
    %c0_11 = arith.constant 0 : index
    %c0_12 = arith.constant 0 : index
    %27 = vector.load %arg2[%c0_11, %c0_12] : memref<32x16xbf16, #tpu.memory_space<vmem>>, vector<32x16xbf16>
    %28 = vector.shape_cast %27 : vector<32x16xbf16> to vector<1x32x16xbf16>
    %29 = vector.broadcast %28 : vector<1x32x16xbf16> to vector<4x32x16xbf16>
    %30 = arith.truncf %26 : vector<4x16x128xf32> to vector<4x16x128xbf16>
    %cst_13 = arith.constant dense<0.000000e+00> : vector<4x32x128xf32>
    %31 = tpu.matmul %29, %30, %cst_13 {dimension_numbers = #tpu.dot_dimension_numbers<[2], [1], [1], [2], [0, 0, 0, 1, 1, 2], [0], [0]>} : vector<4x32x16xbf16>, vector<4x16x128xbf16>, vector<4x32x128xf32> -> vector<4x32x128xf32>
    %32 = vector.extract_strided_slice %31 {offsets = [0, 16, 0], sizes = [4, 16, 128], strides = [1, 1, 1]} : vector<4x32x128xf32> to vector<4x16x128xf32>
    %33 = vector.extract_strided_slice %31 {offsets = [0, 0, 0], sizes = [4, 16, 128], strides = [1, 1, 1]} : vector<4x32x128xf32> to vector<4x16x128xf32>
    %34 = tpu.concatenate %32, %33 in 1 : vector<4x16x128xf32>, vector<4x16x128xf32> -> vector<4x32x128xf32>
    %c0_14 = arith.constant 0 : index
    %c0_15 = arith.constant 0 : index
    %35 = vector.load %arg4[%c0_14, %c0_15] : memref<32x128xf32, #tpu.memory_space<vmem>>, vector<32x128xf32>
    %36 = vector.shape_cast %35 : vector<32x128xf32> to vector<1x32x128xf32>
    %37 = vector.broadcast %36 : vector<1x32x128xf32> to vector<4x32x128xf32>
    %38 = arith.mulf %31, %37 : vector<4x32x128xf32>
    %c0_16 = arith.constant 0 : index
    %c0_17 = arith.constant 0 : index
    %39 = vector.load %arg5[%c0_16, %c0_17] : memref<32x128xf32, #tpu.memory_space<vmem>>, vector<32x128xf32>
    %40 = vector.shape_cast %39 : vector<32x128xf32> to vector<1x32x128xf32>
    %41 = vector.broadcast %40 : vector<1x32x128xf32> to vector<4x32x128xf32>
    %42 = arith.mulf %34, %41 : vector<4x32x128xf32>
    %43 = arith.addf %38, %42 : vector<4x32x128xf32>
    %c0_18 = arith.constant 0 : index
    %c0_19 = arith.constant 0 : index
    %44 = vector.load %arg3[%c0_18, %c0_19] : memref<16x32xbf16, #tpu.memory_space<vmem>>, vector<16x32xbf16>
    %45 = vector.shape_cast %44 : vector<16x32xbf16> to vector<1x16x32xbf16>
    %46 = vector.broadcast %45 : vector<1x16x32xbf16> to vector<4x16x32xbf16>
    %47 = arith.truncf %43 : vector<4x32x128xf32> to vector<4x32x128xbf16>
    %cst_20 = arith.constant dense<0.000000e+00> : vector<4x16x128xf32>
    %48 = tpu.matmul %46, %47, %cst_20 {dimension_numbers = #tpu.dot_dimension_numbers<[2], [1], [1], [2], [0, 0, 0, 1, 1, 2], [0], [0]>} : vector<4x16x32xbf16>, vector<4x32x128xbf16>, vector<4x16x128xf32> -> vector<4x16x128xf32>
    %49 = arith.addf %26, %48 : vector<4x16x128xf32>
    %50 = vector.shape_cast %49 : vector<4x16x128xf32> to vector<64x128xf32>
    %51 = arith.truncf %50 : vector<64x128xf32> to vector<64x128xbf16>
    %c0_21 = arith.constant 0 : index
    %c0_22 = arith.constant 0 : index
    %52 = vector.load %arg8[%c0_21, %c0_22] : memref<128x128xbf16, #tpu.memory_space<vmem>>, vector<128x128xbf16>
    %cst_23 = arith.constant dense<0.000000e+00> : vector<64x128xf32>
    %53 = tpu.matmul %51, %52, %cst_23 {dimension_numbers = #tpu.dot_dimension_numbers<[1], [0], [0], [1], [0, 0, 1, 1], [], []>} : vector<64x128xbf16>, vector<128x128xbf16>, vector<64x128xf32> -> vector<64x128xf32>
    %c0_24 = arith.constant 0 : index
    %c0_25 = arith.constant 0 : index
    %54 = vector.load %arg9[%c0_24, %c0_25] : memref<1x128xf32, #tpu.memory_space<vmem>>, vector<1x128xf32>
    %55 = vector.broadcast %54 : vector<1x128xf32> to vector<64x128xf32>
    %56 = arith.addf %53, %55 : vector<64x128xf32>
    %57 = arith.mulf %56, %56 : vector<64x128xf32>
    %58 = arith.mulf %56, %57 : vector<64x128xf32>
    %cst_26 = arith.constant 4.471500e-02 : f32
    %59 = vector.broadcast %cst_26 : f32 to vector<64x128xf32>
    %60 = arith.mulf %59, %58 : vector<64x128xf32>
    %61 = arith.addf %56, %60 : vector<64x128xf32>
    %cst_27 = arith.constant 0.797884583 : f32
    %62 = vector.broadcast %cst_27 : f32 to vector<64x128xf32>
    %63 = arith.mulf %62, %61 : vector<64x128xf32>
    %64 = math.tanh %63 : vector<64x128xf32>
    %cst_28 = arith.constant 1.000000e+00 : f32
    %65 = vector.broadcast %cst_28 : f32 to vector<64x128xf32>
    %66 = arith.addf %65, %64 : vector<64x128xf32>
    %cst_29 = arith.constant 5.000000e-01 : f32
    %67 = vector.broadcast %cst_29 : f32 to vector<64x128xf32>
    %68 = arith.mulf %67, %66 : vector<64x128xf32>
    %69 = arith.mulf %56, %68 : vector<64x128xf32>
    %cst_30 = arith.constant dense<0.000000e+00> : vector<4x128xf32>
    %70 = vector.multi_reduction <add>, %49, %cst_30 [1] : vector<4x16x128xf32> to vector<4x128xf32>
    %cst_31 = arith.constant 1.600000e+01 : f32
    %71 = vector.broadcast %cst_31 : f32 to vector<4x128xf32>
    %72 = arith.divf %70, %71 : vector<4x128xf32>
    %73 = vector.shape_cast %69 : vector<64x128xf32> to vector<4x16x128xf32>
    %cst_32 = arith.constant dense<0.000000e+00> : vector<4x128xf32>
    %74 = vector.multi_reduction <add>, %73, %cst_32 [1] : vector<4x16x128xf32> to vector<4x128xf32>
    %cst_33 = arith.constant 1.600000e+01 : f32
    %75 = vector.broadcast %cst_33 : f32 to vector<4x128xf32>
    %76 = arith.divf %74, %75 : vector<4x128xf32>
    %77 = arith.truncf %76 : vector<4x128xf32> to vector<4x128xbf16>
    %c0_34 = arith.constant 0 : index
    %c0_35 = arith.constant 0 : index
    %78 = vector.load %arg10[%c0_34, %c0_35] : memref<128x128xbf16, #tpu.memory_space<vmem>>, vector<128x128xbf16>
    %cst_36 = arith.constant dense<0.000000e+00> : vector<4x128xf32>
    %79 = tpu.matmul %77, %78, %cst_36 {dimension_numbers = #tpu.dot_dimension_numbers<[1], [0], [0], [1], [0, 0, 1, 1], [], []>} : vector<4x128xbf16>, vector<128x128xbf16>, vector<4x128xf32> -> vector<4x128xf32>
    %80 = arith.addf %72, %79 : vector<4x128xf32>
    %c0_37 = arith.constant 0 : index
    %c0_38 = arith.constant 0 : index
    %81 = vector.load %arg11[%c0_37, %c0_38] : memref<1x128xf32, #tpu.memory_space<vmem>>, vector<1x128xf32>
    %82 = vector.broadcast %81 : vector<1x128xf32> to vector<4x128xf32>
    %83 = arith.addf %80, %82 : vector<4x128xf32>
    %84 = arith.truncf %83 : vector<4x128xf32> to vector<4x128xbf16>
    %c0_39 = arith.constant 0 : index
    %c0_40 = arith.constant 0 : index
    %85 = vector.load %arg12[%c0_39, %c0_40] : memref<128x128xbf16, #tpu.memory_space<vmem>>, vector<128x128xbf16>
    %cst_41 = arith.constant dense<0.000000e+00> : vector<4x128xf32>
    %86 = tpu.matmul %84, %85, %cst_41 {dimension_numbers = #tpu.dot_dimension_numbers<[1], [0], [0], [1], [0, 0, 1, 1], [], []>} : vector<4x128xbf16>, vector<128x128xbf16>, vector<4x128xf32> -> vector<4x128xf32>
    %c0_42 = arith.constant 0 : index
    %c0_43 = arith.constant 0 : index
    %87 = vector.load %arg13[%c0_42, %c0_43] : memref<1x128xf32, #tpu.memory_space<vmem>>, vector<1x128xf32>
    %88 = vector.broadcast %87 : vector<1x128xf32> to vector<4x128xf32>
    %89 = arith.addf %86, %88 : vector<4x128xf32>
    %c0_44 = arith.constant 0 : index
    %c0_45 = arith.constant 0 : index
    %c0_46 = arith.constant 0 : index
    %90 = vector.load %arg14[%c0_44, %c0_45, %c0_46] : memref<1x4x128xf32, #tpu.memory_space<vmem>>, vector<1x4x128xf32>
    %91 = vector.shape_cast %90 : vector<1x4x128xf32> to vector<4x128xf32>
    %92 = vector.shape_cast %89 : vector<4x128xf32> to vector<1x4x128xf32>
    tpu.vector_store %arg14[%c0_44, %c0_45, %c0_46], %92 {strides = array<i32>} : memref<1x4x128xf32, #tpu.memory_space<vmem>>, vector<1x4x128xf32>,
    return
  }
  func.func @transform_0(%arg0: i32) -> (i32, i32, i32) {
    %c0_i32 = arith.constant 0 : i32
    %c0_i32_0 = arith.constant 0 : i32
    %c0_i32_1 = arith.constant 0 : i32
    return %arg0, %c0_i32, %c0_i32_0 : i32, i32, i32
  }
  func.func @transform_1(%arg0: i32) -> (i32, i32) {
    %c0_i32 = arith.constant 0 : i32
    %c0_i32_0 = arith.constant 0 : i32
    %c0_i32_1 = arith.constant 0 : i32
    return %c0_i32, %c0_i32_0 : i32, i32
  }
  func.func @transform_2(%arg0: i32) -> (i32, i32) {
    %c0_i32 = arith.constant 0 : i32
    %c0_i32_0 = arith.constant 0 : i32
    %c0_i32_1 = arith.constant 0 : i32
    return %c0_i32, %c0_i32_0 : i32, i32
  }
  func.func @transform_3(%arg0: i32) -> (i32, i32) {
    %c0_i32 = arith.constant 0 : i32
    %c0_i32_0 = arith.constant 0 : i32
    %c0_i32_1 = arith.constant 0 : i32
    return %c0_i32, %c0_i32_0 : i32, i32
  }
  func.func @transform_4(%arg0: i32) -> (i32, i32) {
    %c0_i32 = arith.constant 0 : i32
    %c0_i32_0 = arith.constant 0 : i32
    %c0_i32_1 = arith.constant 0 : i32
    return %c0_i32, %c0_i32_0 : i32, i32
  }
  func.func @transform_5(%arg0: i32) -> (i32, i32) {
    %c0_i32 = arith.constant 0 : i32
    %c0_i32_0 = arith.constant 0 : i32
    %c0_i32_1 = arith.constant 0 : i32
    return %c0_i32, %c0_i32_0 : i32, i32
  }
  func.func @transform_6(%arg0: i32) -> (i32, i32) {
    %c0_i32 = arith.constant 0 : i32
    %c0_i32_0 = arith.constant 0 : i32
    %c0_i32_1 = arith.constant 0 : i32
    return %c0_i32, %c0_i32_0 : i32, i32
  }
  func.func @transform_7(%arg0: i32) -> (i32, i32) {
    %c0_i32 = arith.constant 0 : i32
    %c0_i32_0 = arith.constant 0 : i32
    %c0_i32_1 = arith.constant 0 : i32
    return %c0_i32, %c0_i32_0 : i32, i32
  }
  func.func @transform_8(%arg0: i32) -> (i32, i32) {
    %c0_i32 = arith.constant 0 : i32
    %c0_i32_0 = arith.constant 0 : i32
    %c0_i32_1 = arith.constant 0 : i32
    return %c0_i32, %c0_i32_0 : i32, i32
  }
  func.func @transform_9(%arg0: i32) -> (i32, i32) {
    %c0_i32 = arith.constant 0 : i32
    %c0_i32_0 = arith.constant 0 : i32
    %c0_i32_1 = arith.constant 0 : i32
    return %c0_i32, %c0_i32_0 : i32, i32
  }
  func.func @transform_10(%arg0: i32) -> (i32, i32) {
    %c0_i32 = arith.constant 0 : i32
    %c0_i32_0 = arith.constant 0 : i32
    %c0_i32_1 = arith.constant 0 : i32
    return %c0_i32, %c0_i32_0 : i32, i32
  }
  func.func @transform_11(%arg0: i32) -> (i32, i32) {
    %c0_i32 = arith.constant 0 : i32
    %c0_i32_0 = arith.constant 0 : i32
    %c0_i32_1 = arith.constant 0 : i32
    return %c0_i32, %c0_i32_0 : i32, i32
  }
  func.func @transform_12(%arg0: i32) -> (i32, i32) {
    %c0_i32 = arith.constant 0 : i32
    %c0_i32_0 = arith.constant 0 : i32
    %c0_i32_1 = arith.constant 0 : i32
    return %c0_i32, %c0_i32_0 : i32, i32
  }
  func.func @transform_13(%arg0: i32) -> (i32, i32, i32) {
    %c0_i32 = arith.constant 0 : i32
    %c0_i32_0 = arith.constant 0 : i32
    %c0_i32_1 = arith.constant 0 : i32
    return %arg0, %c0_i32, %c0_i32_0 : i32, i32, i32
  }
}

</mosaic_0001>

<bundles_post_ra>
// kernel: tpu_custom_call.1
= control target key start
LH: loop header
LB: loop body
LE: loop exit
PB: predicated region body
PF: predicated region fallthrough
CT: control target
= control target key end

     0   :  { %s2948_s0 = inlined_call_operand.vmem [shape: f32[8,16,8], index: 0, kind: input, shape index: {}]   ;;  %s2949_s1 = inlined_call_operand.vmem [shape: bf16[32,16], index: 1, kind: input, shape index: {}]   ;;  %s2950_s2 = inlined_call_operand.hbm [shape: bf16[16,32], index: 2, kind: input, shape index: {}]   ;;  %s2951_s3 = inlined_call_operand.vmem [shape: f32[32,128], index: 3, kind: input, shape index: {}]   ;;  %s2952_s4 = inlined_call_operand.hbm [shape: f32[32,128], index: 4, kind: input, shape index: {}]   ;;  %s2953_s5 = inlined_call_operand.vmem [shape: bf16[8,128], index: 5, kind: input, shape index: {}]   ;;  %s2954_s6 = inlined_call_operand.vmem [shape: f32[1,128], index: 6, kind: input, shape index: {}]   ;;  %s2955_s7 = inlined_call_operand.vmem [shape: bf16[128,128], index: 7, kind: input, shape index: {}]   ;;  %s2956_s8 = inlined_call_operand.vmem [shape: f32[1,128], index: 8, kind: input, shape index: {}]   ;;  %s2957_s9 = inlined_call_operand.vmem [shape: bf16[128,128], index: 9, kind: input, shape index: {}]   ;;  %s2958_s10 = inlined_call_operand.vmem [shape: f32[1,128], index: 10, kind: input, shape index: {}]   ;;  %s2959_s11 = inlined_call_operand.vmem [shape: bf16[128,128], index: 11, kind: input, shape index: {}]   ;;  %s2960_s12 = inlined_call_operand.vmem [shape: f32[1,128], index: 12, kind: input, shape index: {}]   ;;  %s2961_s13 = inlined_call_operand.hbm [shape: f32[2,4,128], index: 13, kind: output, shape index: {}]  }
   0x1   :  { %2972 = sst [smem:[#allocation17_spill]] %s2961_s13 }
   0x2   :  { %18 = vsyncpa [#allocation3], 0 }
   0x3   :  { %19 = vsyncpa [#allocation6], 0 }
   0x4   :  { %20 = vsyncpa [#allocation4], 0 }
   0x5   :  { %22 = vsyncpa [#allocation4 + $0x1], 0  ;;  %s2394_s25 = smov 0   ;;  %s2396_s26 = smov 0  }
   0x6   :  { %s2398_s27 = smov 0   ;;  %s2400_s28 = smov 0  }
   0x7 LB: > { %2973 = sst [smem:[#allocation11_spill]] %s2301_s25  ;;  %s2415_s29 = sadd.s32 4294967295, %s2313_s28   ;;  %s2313_s28 = sphi %s2400_s28, %s2994_s28   ;;  %s2309_s27 = sphi %s2398_s27, %s2999_s27   ;;  %s2305_s26 = sphi %s2396_s26, %s2998_s26   ;;  %s2301_s25 = sphi %s2394_s25, %s2997_s25  }
   0x8   : > { %2974 = sst [smem:[#allocation12_spill]] %s2309_s27  ;;  %s1816_s30 = sadd.s32 4294967294, %s2313_s28  }
   0x9   : > { %2975 = sst [smem:[#allocation13_spill]] %s2313_s28  ;;  %s2419_s14 = sadd.s32 1, %s2313_s28  }
   0xa   : > { %2976 = sst [smem:[#allocation14_spill]] %s2419_s14  ;;  %s313_s15 = sadd.s32 1, %s2309_s27 }
   0xb   : > { %s310_s16 = ssub.s32 %s2313_s28, %s2419_s14  ;;  %p323_p0 = scmp.ne.s32.totalorder %s2309_s27, %s2305_s26 }
   0xc   : > { %p311_p1 = scmp.eq.s32.totalorder %s310_s16, 0  ;;  %p324_p2 = scmp.eq.s32.totalorder %s2415_s29, 1 }
   0xd   : > { %p329_p3 = scmp.ne.s32.totalorder %s2305_s26, %s2301_s25  ;;  %p330_p4 = scmp.eq.s32.totalorder %s1816_s30, 1 }
   0xe   : > { %s2430_s17 = scalar_select %p311_p1, %s2309_s27, %s313_s15  }
   0xf   : > { %p2432_p5 = por %p324_p2, %p323_p0  ;;  %p2436_p6 = por %p330_p4, %p329_p3 }
  0x10   : > { %2977 = sst [smem:[#allocation15_spill]] %s2430_s17  ;;  %p1817_p7 = scmp.ge.s32.totalorder %s2313_s28, 1 }
  0x11   : > { %s2978_s18 = scalar_select %p2432_p5, 1, 0 }
  0x12   : > { %s2979_s19 = scalar_select %p2436_p6, 1, 0 }
  0x13   : > { %p337_p8 = scmp.lt.s32.totalorder %s2313_s28, 3  ;;  %p2966_p9 = scmp.eq.s32.totalorder %s2415_s29, 0 }
  0x14   : > { %2980 = sst [smem:[#allocation16_spill]] %s2979_s19  ;;  %s2315_s21 = smov [#allocation2]  }
  0x15   : > { %p2443_p10 = pnand %p1817_p7, %p337_p8  ;;  %s352_s22 = sshll.u32 %s2315_s21, 4  ;;  %s353_s22 = int_to_ptr.vmem [resolvable:$true] %s352_s22 }
  0x16   : > { %s2316_s24 = smov [#allocation5]   ;;  %s2187_s17 = scalar_lea.hbm %s2950_s2, 128 }
  0x17   : > { %s2981_s20 = scalar_select %p2443_p10, 1, 0 }
  0x18   : > { %p2080_p11 = pneg %p2443_p10  ;;  %s368_s30 = sshll.u32 %s2316_s24, 4  ;;  %s2455_s30 = int_to_ptr.vmem [resolvable:$true] %s368_s30 }
  0x19   : > { %p2188_p13 = scmp.ne.s32.totalorder %s2950_s2, %s2187_s17  ;;  %p2194_p3 = scmp.lt.u32.totalorder %s2187_s17, %s2950_s2 }
  0x1a   : > { %p2451_p12 = pnand %p2966_p9, %p2080_p11 }
  0x1c   : > { %p2189_p0 = pneg %p2451_p12 }
  0x1e   : > { %p2190_p1 = pnand %p2189_p0, %p2188_p13 }
  0x20   : > { %p2191_p2 = pneg %p2190_p1 }
  0x22   : > { %p2196_p4 = pnand %p2194_p3, %p2191_p2 }
  0x24   : > { %2199 = shalt.err (!%p2196_p4)
}
  0x25   : > { %s2200_s24 = scalar_lea.vmem %s353_s22, 128  ;;  %p2208_p9 = scmp.lt.s32.totalorder %s353_s22, %s353_s22 }
  0x26   : > { %p2201_p7 = scmp.ne.s32.totalorder %s353_s22, %s2200_s24  ;;  %p2209_p6 = scmp.lt.s32.totalorder %s2200_s24, %s2200_s24 }
  0x28   : > { %p2203_p8 = pnand %p2201_p7, %p2189_p0  ;;  %p2210_p5 = por %p2209_p6, %p2208_p9 }
  0x2a   : > { %p2204_p11 = pneg %p2203_p8 }
  0x2c   : > { %p2211_p10 = pnand %p2210_p5, %p2204_p11 }
  0x2e   : > { %2214 = shalt.err (!%p2211_p10)
}
  0x2f   : > { %s2317_s27 = smov 64   ;;  %s2318_s15 = smov 4  }
  0x30   : > { %2083 = dma.hbm_to_vmem [thread:$0]  (!%p2451_p12), %s2950_s2, 128, %s353_s22, [#allocation3], %s2317_s27, %s2317_s27, %s2318_s15  }
  0x31   : > { %s2215_s21 = scalar_lea.hbm %s2952_s4, 512 }
  0x32   : > { %p2216_p13 = scmp.ne.s32.totalorder %s2952_s4, %s2215_s21  ;;  %p2222_p9 = scmp.lt.u32.totalorder %s2215_s21, %s2952_s4 }
  0x34   : > { %p2218_p5 = pnand %p2216_p13, %p2189_p0 }
  0x36   : > { %p2219_p6 = pneg %p2218_p5 }
  0x38   : > { %p2224_p10 = pnand %p2222_p9, %p2219_p6 }
  0x3a   : > { %2227 = shalt.err (!%p2224_p10)
}
  0x3b   : > { %s2228_s22 = scalar_lea.vmem %s2455_s30, 512  ;;  %p2236_p4 = scmp.lt.s32.totalorder %s2455_s30, %s2455_s30 }
  0x3c   : > { %p2229_p1 = scmp.ne.s32.totalorder %s2455_s30, %s2228_s22  ;;  %p2237_p7 = scmp.lt.s32.totalorder %s2228_s22, %s2228_s22 }
  0x3e   : > { %p2231_p2 = pnand %p2229_p1, %p2189_p0  ;;  %p2238_p8 = por %p2237_p7, %p2236_p4 }
  0x40   : > { %p2232_p3 = pneg %p2231_p2 }
  0x42   : > { %p2239_p11 = pnand %p2238_p8, %p2232_p3 }
  0x44   : > { %2242 = shalt.err (!%p2239_p11)
}
  0x45   : > { %s2319_s13 = smov 128   ;;  %s2320_s25 = smov 8  }
  0x46   : > { %2086 = dma.hbm_to_vmem [thread:$0]  (!%p2451_p12), %s2952_s4, 512, %s2455_s30, [#allocation6], %s2319_s13, %s2319_s13, %s2320_s25  }
  0x47   : > { %p2983_p13 = scmp.ne.s32.totalorder %s2981_s20, 0 }
  0x48   : > { %p2984_p0 = scmp.eq.s32.totalorder (!%p2983_p13), %s2415_s29, 0 }
  0x49   : > { %418 = sbr.rel (%p2983_p13) target bundleno = 1542 (0x606), region = 72 }
  0x50   : > { %2288 = dma.done.wait (%p2984_p0), [#allocation3], 128   ;;  %p2985_p5 = pmov %p2984_p0 }
  0x51   : > { %p2986_p6 = pmov %p2984_p0 }
  0x52   : > { %2290 = vsyncadd (%p2985_p5), [#allocation3], 4294967168 }
  0x53   : > { %2292 = dma.done.wait (%p2986_p6), [#allocation6], 512   ;;  %p2987_p9 = pmov %p2984_p0 }
  0x54   : > { %s1825_s23 = sshll.u32 %s2415_s29, 2  ;;  %vm629_vm0 = vcmask 1043456   ;;  %vm483_vm1 = vcmask 64512   ;;  %v609_v0 = vld [vmem:[%s2953_s5] sm:$0xf]  ;;  %vm716_vm2 = vcmask 130048  }
  0x55   : > { %2294 = vsyncadd (%p2987_p9), [#allocation6], 4294966784  ;;  %p468_p10 = scmp.lt.s32.totalorder %s1825_s23, 7  ;;  %2069 = vmatprep.subr.msk.bf16.mxu1 %vm629_vm0, %v609_v0  ;;  %v631_v3 = vsel %vm629_vm0, %v609_v0, 0  ;;  %vm2322_vm3 = vmmov 0   ;;  %vm990_vm4 = vcmask 261120  }
  0x56   : > { %1940 = vmatpush3.bf16.msra.mxu1 %v631_v3  ;;  %vm1470_vm5 = vcmask 1041409   ;;  %vm1472_vm6 = vcmask 1042434   ;;  %vm1474_vm7 = vcmask 1043459   ;;  %s464_s28 = sand.u32 1, %s2305_s26   ;;  %s1876_s20 = sshll.u32 %s2415_s29, 6 }
  0x57   : > { %s3001_s23 = smov (!%p468_p10, %s1825_s23), 7  ;;  %s1824_s27 = sshll.u32 %s464_s28, 2 }
  0x58   : > { %s1879_s30 = sshll.u32 %s3001_s23, 4  ;;  %s466_s15 = scalar_lea.vmem [#allocation7], %s1824_s27 }
  0x59   : > { %s2518_s14 = scalar_lea.vmem %s2948_s0, %s1879_s30  ;;  %s2988_s16 = sld [smem:[#allocation17_spill]] }
  0x5a   : > { %v2524_v1 = vld [vmem:[%s2518_s14] sm:$0xff]  ;;  %v2527_v2 = vld [vmem:[%s2518_s14 + $0x8] sm:$0xff]  ;;  %v2536_v7 = vld [vmem:[%s2518_s14 + $0x10] sm:$0xff]  ;;  %s1722_s24 = scalar_lea.sflag [#allocation4], %s464_s28  ;;  %p2989_p1 = scmp.ne.s32.totalorder %s2978_s18, 0 }
  0x5b   : > { %v484_v4 = vsel %vm483_vm1, %v2524_v1, 0.0  ;;  %v485_v5 = vsel %vm483_vm1, %v2527_v2, 0.0  ;;  %v525_v6 = vmul.f32 %v2524_v1, %v2524_v1  ;;  %v2539_v8 = vld [vmem:[%s2518_s14 + $0x18] sm:$0xff]  ;;  %v2542_v9 = vld [vmem:[%s2518_s14 + $0x20] sm:$0xff]  ;;  %v526_v11 = vmul.f32 %v2527_v2, %v2527_v2  ;;  %v2551_v14 = vld [vmem:[%s2518_s14 + $0x28] sm:$0xff]  ;;  %s2323_s22 = smov [#allocation7]  }
  0x5c   : > { %v486_v10 = vadd.f32 %v485_v5, %v484_v4  ;;  %v493_v12 = vsel %vm483_vm1, %v2536_v7, 0.0  ;;  %v494_v13 = vsel %vm483_vm1, %v2539_v8, 0.0  ;;  %v527_v17 = vmul.f32 %v2536_v7, %v2536_v7  ;;  %v2559_v19 = vld [vmem:[%s2518_s14 + $0x30] sm:$0xff]  ;;  %v2569_v28 = vld [vmem:[%s2518_s14 + $0x38] sm:$0xff]  ;;  %s1735_s14 = sshll.u32 %s466_s15, 4  ;;  %s2247_s13 = sshll.u32 %s2323_s22, 4  ;;  %s2908_s14 = int_to_ptr.vmem [resolvable:$true] %s1735_s14  ;;  %s2248_s13 = int_to_ptr.vmem [resolvable:$false] %s2247_s13 }
  0x5d   : > { %v533_v15 = vsel %vm483_vm1, %v525_v6, 0.0  ;;  %v495_v16 = vadd.f32 %v494_v13, %v493_v12  ;;  %v528_v18 = vmul.f32 %v2539_v8, %v2539_v8  ;;  %v534_v21 = vsel %vm483_vm1, %v526_v11, 0.0  ;;  %s2243_s29 = scalar_lea.vmem %s2908_s14, 64  ;;  %s2249_s25 = scalar_lea.vmem %s2248_s13, 128 }
  0x5e   : > { %v487_v20 = vrot.slane %v486_v10, 4  ;;  %v502_v22 = vsel %vm483_vm1, %v2542_v9, 0.0  ;;  %v503_v23 = vsel %vm483_vm1, %v2551_v14, 0.0  ;;  %v535_v24 = vadd.f32 %v534_v21, %v533_v15  ;;  %p2244_p12 = scmp.ne.s32.totalorder %s2908_s14, %s2243_s29  ;;  %p2250_p4 = scmp.lt.s32.totalorder %s2908_s14, %s2248_s13 }
  0x5f   : > { %v496_v25 = vrot.slane %v495_v16, 4  ;;  %v542_v26 = vsel %vm483_vm1, %v527_v17, 0.0  ;;  %v543_v27 = vsel %vm483_vm1, %v528_v18, 0.0  ;;  %v504_v31 = vadd.f32 %v503_v23, %v502_v22  ;;  %s2906_s21 = scalar_lea.hbm %s2988_s16, %s1876_s20  ;;  %p2251_p7 = scmp.lt.s32.totalorder %s2249_s25, %s2243_s29 }
  0x60   : > { %v488_v29 = vadd.f32 %v487_v20, %v486_v10  ;;  %v544_v30 = vadd.f32 %v543_v27, %v542_v26  ;;  %v529_v32 = vmul.f32 %v2542_v9, %v2542_v9  ;;  %v536_v33 = vrot.slane %v535_v24, 4  ;;  %p2245_p2 = pnand %p2244_p12, %p2989_p1 }
  0x61   : > { %v497_v34 = vadd.f32 %v496_v25, %v495_v16  ;;  %v530_v35 = vmul.f32 %v2551_v14, %v2551_v14  ;;  %v511_v36 = vsel %vm483_vm1, %v2559_v19, 0.0  ;;  %v505_v39 = vrot.slane %v504_v31, 4  ;;  %p2252_p8 = por %p2251_p7, %p2250_p4 }
  0x62   : > { %v489_v37 = vrot.slane %v488_v29, 2  ;;  %v545_v38 = vrot.slane %v544_v30, 4  ;;  %v551_v40 = vsel %vm483_vm1, %v529_v32, 0.0  ;;  %v537_v41 = vadd.f32 %v536_v33, %v535_v24  ;;  %p2246_p3 = pneg %p2245_p2 }
  0x63   : > { %v498_v42 = vrot.slane %v497_v34, 2  ;;  %v552_v43 = vsel %vm483_vm1, %v530_v35, 0.0  ;;  %v512_v44 = vsel %vm483_vm1, %v2569_v28, 0.0  ;;  %v506_v47 = vadd.f32 %v505_v39, %v504_v31 }
  0x64   : > { %v490_v45 = vadd.f32 %v489_v37, %v488_v29  ;;  %v546_v46 = vadd.f32 %v545_v38, %v544_v30  ;;  %v553_v48 = vadd.f32 %v552_v43, %v551_v40  ;;  %v538_v49 = vrot.slane %v537_v41, 2  ;;  %p2253_p11 = pnand %p2252_p8, %p2246_p3 }
  0x65   : > { %v499_v50 = vadd.f32 %v498_v42, %v497_v34  ;;  %v513_v51 = vadd.f32 %v512_v44, %v511_v36  ;;  %v531_v52 = vmul.f32 %v2559_v19, %v2559_v19  ;;  %v507_v55 = vrot.slane %v506_v47, 2 }
  0x66   : > { %v491_v53 = vrot.slane %v490_v45, 1  ;;  %v547_v54 = vrot.slane %v546_v46, 2  ;;  %v554_v56 = vrot.slane %v553_v48, 4  ;;  %v539_v57 = vadd.f32 %v538_v49, %v537_v41 }
  0x67   : > { %v500_v58 = vrot.slane %v499_v50, 1  ;;  %v514_v59 = vrot.slane %v513_v51, 4  ;;  %v532_v60 = vmul.f32 %v2569_v28, %v2569_v28  ;;  %v508_v63 = vadd.f32 %v507_v55, %v506_v47 }
  0x68   : > { %v492_v61 = vadd.f32 %v491_v53, %v490_v45  ;;  %v548_v62 = vadd.f32 %v547_v54, %v546_v46  ;;  %v555_v0 = vadd.f32 %v554_v56, %v553_v48  ;;  %v540_v3 = vrot.slane %v539_v57, 1 }
  0x69   : > { %v501_v4 = vadd.f32 %v500_v58, %v499_v50  ;;  %v515_v5 = vadd.f32 %v514_v59, %v513_v51  ;;  %v560_v6 = vsel %vm483_vm1, %v531_v52, 0.0  ;;  %v509_v12 = vrot.slane %v508_v63, 1 }
  0x6a   : > { %v521_v10 = vmul.f32 0.0625, %v492_v61  ;;  %v549_v11 = vrot.slane %v548_v62, 1  ;;  %v556_v13 = vrot.slane %v555_v0, 2  ;;  %v541_v15 = vadd.f32 %v540_v3, %v539_v57 }
  0x6b   : > { %v522_v16 = vmul.f32 0.0625, %v501_v4  ;;  %v516_v17 = vrot.slane %v515_v5, 2  ;;  %v561_v18 = vsel %vm483_vm1, %v532_v60, 0.0  ;;  %v510_v25 = vadd.f32 %v509_v12, %v508_v63 }
  0x6c   : > { %v573_v20 = vmul.f32 %v521_v10, %v521_v10  ;;  %v550_v21 = vadd.f32 %v549_v11, %v548_v62  ;;  %v569_v22 = vmul.f32 0.0625, %v541_v15  ;;  %v557_v26 = vadd.f32 %v556_v13, %v555_v0  ;;  %v2136_v13 = vld [vmem:[%s2949_s1] sm:$0xff]  }
  0x6d   : > { %v574_v23 = vmul.f32 %v522_v16, %v522_v16  ;;  %v517_v27 = vadd.f32 %v516_v17, %v515_v5  ;;  %v562_v30 = vadd.f32 %v561_v18, %v560_v6  ;;  %v523_v32 = vmul.f32 0.0625, %v510_v25  ;;  %1963 = vmatprep.mubr.msk.bf16.mxu0 %vm716_vm2, %v2136_v13  ;;  %v2137_v25 = vld [vmem:[%s2949_s1 + $0x8] sm:$0xff]  }
  0x6e   : > { %v570_v24 = vmul.f32 0.0625, %v550_v21  ;;  %v577_v29 = vsub.f32 %v569_v22, %v573_v20  ;;  %v558_v33 = vrot.slane %v557_v26, 1  ;;  %v581_v49 = vsub.f32 %v2524_v1, %v521_v10 }
  0x6f   : > { %v518_v34 = vrot.slane %v517_v27, 1  ;;  %v563_v36 = vrot.slane %v562_v30, 4  ;;  %v575_v39 = vmul.f32 %v523_v32, %v523_v32  ;;  %v582_v50 = vsub.f32 %v2527_v2, %v521_v10 }
  0x70   : > { %v578_v31 = vsub.f32 %v570_v24, %v574_v23  ;;  %v589_v35 = vadd.f32 1e-05, %v577_v29  ;;  %v559_v38 = vadd.f32 %v558_v33, %v557_v26  ;;  %v583_v51 = vsub.f32 %v2536_v7, %v522_v16 }
  0x71   : > { %v519_v40 = vadd.f32 %v518_v34, %v517_v27  ;;  %v564_v41 = vadd.f32 %v563_v36, %v562_v30  ;;  %v584_v52 = vsub.f32 %v2539_v8, %v522_v16  ;;  %v585_v1 = vsub.f32 %v2542_v9, %v523_v32 }
  0x72   : > { %v590_v37 = vadd.f32 1e-05, %v578_v31  ;;  %2163 = vrsqrt.f32 %v589_v35  ;;  %v571_v42 = vmul.f32 0.0625, %v559_v38  ;;  %v586_v2 = vsub.f32 %v2551_v14, %v523_v32  ;;  %v921_v38 = vld [vmem:[%s2951_s3 + $0x10] sm:$0xff] }
  0x73   : > { %v524_v43 = vmul.f32 0.0625, %v519_v40  ;;  %v565_v44 = vrot.slane %v564_v41, 2  ;;  %v2652_v40 = vld [vmem:[%s2951_s3] sm:$0xff] }
  0x74   : > { %2165 = vrsqrt.f32 %v590_v37  ;;  %v579_v45 = vsub.f32 %v571_v42, %v575_v39  ;;  %v2321_v37 = vmov 0.0   ;;  %v939_v39 = vld [vmem:[#allocation5] sm:$0xff] }
  0x75   : > { %v566_v46 = vadd.f32 %v565_v44, %v564_v41  ;;  %v576_v54 = vmul.f32 %v524_v43, %v524_v43  ;;  %v587_v6 = vsub.f32 %v2559_v19, %v524_v43  ;;  %v588_v10 = vsub.f32 %v2569_v28, %v524_v43  ;;  %v1828_v19 = vld [vmem:[%s2954_s6] ss:$0 sm:$0xff]  ;;  %v2654_v41 = vld [vmem:[#allocation5 + $0x10] sm:$0xff]  ;;  %v2661_v44 = vld [vmem:[#allocation5 + $0x8] sm:$0xff] }
  0x76   : > { %v591_v47 = vadd.f32 1e-05, %v579_v45  ;;  %v2659_v43 = vld [vmem:[%s2951_s3 + $0x18] sm:$0xff] }
  0x77   : > { %v567_v48 = vrot.slane %v566_v46, 1 }
  0x78   : > { %2167 = vrsqrt.f32 %v591_v47 }
  0x79   : > { %v568_v53 = vadd.f32 %v567_v48, %v566_v46  ;;  %v2666_v48 = vld [vmem:[%s2951_s3 + $0x8] sm:$0xff] }
  0x7b   : > { %v572_v56 = vmul.f32 0.0625, %v568_v53 }
  0x7c   : > { %v2164_v55 = vpop.eup %2163 }
  0x7d   : > { %v597_v58 = vmul.f32 %v2164_v55, %v581_v49  ;;  %v598_v59 = vmul.f32 %v2164_v55, %v582_v50  ;;  %v580_v62 = vsub.f32 %v572_v56, %v576_v54  ;;  %v2668_v49 = vld [vmem:[#allocation5 + $0x18] sm:$0xff] }
  0x7e   : > { %v2166_v57 = vpop.eup %2165 }
  0x7f   : > { %v599_v60 = vmul.f32 %v2166_v57, %v583_v51  ;;  %v600_v61 = vmul.f32 %v2166_v57, %v584_v52  ;;  %v605_v63 = vpack.c.bf16 %v598_v59, %v597_v58  ;;  %v592_v3 = vadd.f32 1e-05, %v580_v62 }
  0x81   : > { %v606_v0 = vpack.c.bf16 %v600_v61, %v599_v60  ;;  %1941 = vmatprep.mubr.msk.bf16.mxu1 %vm483_vm1, %v605_v63  ;;  %2169 = vrsqrt.f32 %v592_v3 }
  0x82   : > { %v2168_v7 = vpop.eup %2167 }
  0x83   : > { %1942 = vmatmul.mubr.msk.bf16.vlgmr.msra.gmra.mrb[0].mxu1 %vm483_vm1, %v606_v0  ;;  %v601_v8 = vmul.f32 %v2168_v7, %v585_v1  ;;  %v602_v4 = vmul.f32 %v2168_v7, %v586_v2 }
  0x85   : > { %v607_v5 = vpack.c.bf16 %v602_v4, %v601_v8 }
  0x87   : > { %1945 = vmatprep.mubr.msk.bf16.mxu1 %vm483_vm1, %v607_v5 }
  0x8b   : > { %v2170_v11 = vpop.eup %2169 }
  0x8c   : > { %v603_v9 = vmul.f32 %v2170_v11, %v587_v6  ;;  %v604_v12 = vmul.f32 %v2170_v11, %v588_v10 }
  0x8e   : > { %v608_v14 = vpack.c.bf16 %v604_v12, %v603_v9 }
  0x90   : > { %1946 = vmatmul.mubr.msk.bf16.gmra.mrb[4].mxu1 %vm483_vm1, %v608_v14 }
  0x91   : > { %1951 = vmatprep.mubr.msk.bf16.mxu1 %vm716_vm2, %v2136_v13 }
 0x156   : > { %v1943_v15 = vpop.f32.mrb[0].mxu1 }
 0x157   : > { %v667_v28 = vpop.f32.mrb[1].mxu1  ;;  %v2613_v22 = vadd.f32 %v1943_v15, %v1828_v19 }
 0x158   : > { %v1944_v16 = vpop.f32.mrb[2].mxu1  ;;  %v2607_v18 = vadd.f32 %v1828_v19, %v667_v28 }
 0x159   : > { %v670_v17 = vpop.f32.mrb[3].mxu1  ;;  %v2609_v20 = vadd.f32 %v1944_v16, %v1828_v19 }
 0x15a   : > { %v2611_v21 = vadd.f32 %v1828_v19, %v670_v17 }
 0x15b   : > { %v703_v24 = vpack.c.bf16 %v2609_v20, %v2613_v22 }
 0x15c   : > { %v702_v23 = vpack.c.bf16 %v2611_v21, %v2607_v18 }
 0x15e   : > { %1949 = vmatprep.subr.bf16.mxu1 %v702_v23 }
 0x15f   : > { %1950 = vmatpush3.bf16.msra.mxu1 %v702_v23 }
 0x160   : > { %1955 = vmatprep.subr.bf16.mxu1 %v703_v24 }
 0x162   : > { %1952 = vmatmul.mubr.msk.bf16.vlgmr.msra.gmra.mrb[8].mxu1 %vm716_vm2, %v2137_v25 }
 0x163   : > { %1956 = vmatpush3.bf16.msra.mxu1 %v703_v24  ;;  %1957 = vmatprep.mubr.msk.bf16.mxu1 %vm716_vm2, %v2136_v13  ;;  %v1947_v26 = vpop.f32.mrb[4].mxu1 }
 0x164   : > { %v2624_v27 = vadd.f32 %v1947_v26, %v1828_v19  ;;  %v683_v29 = vpop.f32.mrb[5].mxu1 }
 0x165   : > { %v2626_v30 = vadd.f32 %v1828_v19, %v683_v29  ;;  %v1948_v31 = vpop.f32.mrb[6].mxu1 }
 0x166   : > { %v2628_v32 = vadd.f32 %v1948_v31, %v1828_v19  ;;  %v686_v33 = vpop.f32.mrb[7].mxu1 }
 0x167   : > { %v2630_v34 = vadd.f32 %v1828_v19, %v686_v33 }
 0x168   : > { %v705_v35 = vpack.c.bf16 %v2628_v32, %v2624_v27 }
 0x169   : > { %v704_v36 = vpack.c.bf16 %v2630_v34, %v2626_v30 }
 0x16a   : > { %1958 = vmatmul.mubr.msk.bf16.vlgmr.msra.gmra.mrb[12].mxu1 %vm716_vm2, %v2137_v25  ;;  %1967 = vmatprep.subr.bf16.mxu1 %v705_v35 }
 0x16b   : > { %1969 = vmatprep.mubr.msk.bf16.mxu1 %vm716_vm2, %v2136_v13  ;;  %1961 = vmatprep.subr.bf16.mxu0 %v704_v36  ;;  %v2683_v13 = vld [vmem:[#allocation2] sm:$0xff]  }
 0x16c   : > { %1968 = vmatpush3.bf16.msra.mxu1 %v705_v35  ;;  %1962 = vmatpush3.bf16.msra.mxu0 %v704_v36 }
 0x16d   : > { %1973 = vmatprep.subr.bf16.mxu0 %v2321_v37  ;;  %1981 = vmatprep.subr.bf16.mxu1 %v2321_v37 }
 0x16f   : > { %1964 = vmatmul.mubr.msk.bf16.vlgmr.msra.gmra.mrb[0].mxu0 %vm716_vm2, %v2137_v25 }
 0x170   : > { %1977 = vmatprep.mubr.msk.bf16.mxu0 %vm2322_vm3, %v2321_v37 }
 0x172   : > { %1970 = vmatmul.mubr.msk.bf16.vlgmr.msra.gmra.mrb[16].mxu1 %vm716_vm2, %v2137_v25 }
 0x173   : > { %1985 = vmatprep.mubr.msk.bf16.mxu1 %vm2322_vm3, %v2321_v37 }
 0x235   : > { %v1953_v42 = vpop.f32.mrb[8].mxu1 }
 0x236   : > { %v925_v45 = vmul.f32 %v1953_v42, %v921_v38  ;;  %v943_v46 = vmul.f32 %v1953_v42, %v939_v39  ;;  %v757_v47 = vpop.f32.mrb[9].mxu1 }
 0x237   : > { %v923_v50 = vmul.f32 %v2652_v40, %v757_v47  ;;  %v945_v51 = vmul.f32 %v2654_v41, %v757_v47  ;;  %v1954_v52 = vpop.f32.mrb[10].mxu1 }
 0x238   : > { %v926_v53 = vmul.f32 %v1954_v52, %v2659_v43  ;;  %v944_v54 = vmul.f32 %v1954_v52, %v2661_v44  ;;  %v760_v55 = vpop.f32.mrb[11].mxu1 }
 0x239   : > { %v959_v56 = vadd.f32 %v943_v46, %v923_v50  ;;  %v961_v57 = vadd.f32 %v945_v51, %v925_v45  ;;  %v924_v58 = vmul.f32 %v2666_v48, %v760_v55  ;;  %v946_v59 = vmul.f32 %v2668_v49, %v760_v55 }
 0x23b   : > { %v960_v60 = vadd.f32 %v944_v54, %v924_v58  ;;  %v962_v61 = vadd.f32 %v946_v59, %v926_v53 }
 0x23d   : > { %v977_v62 = vpack.c.bf16 %v960_v60, %v959_v56  ;;  %v978_v63 = vpack.c.bf16 %v962_v61, %v961_v57  ;;  %v1959_v0 = vpop.f32.mrb[12].mxu1 }
 0x23e   : > { %v929_v1 = vmul.f32 %v1959_v0, %v921_v38  ;;  %v947_v2 = vmul.f32 %v1959_v0, %v939_v39  ;;  %v806_v3 = vpop.f32.mrb[13].mxu1 }
 0x23f   : > { %v927_v7 = vmul.f32 %v2652_v40, %v806_v3  ;;  %v949_v8 = vmul.f32 %v2654_v41, %v806_v3  ;;  %v1960_v4 = vpop.f32.mrb[14].mxu1  ;;  %1974 = vmatpush3.bf16.msra.mxu0 %v977_v62  ;;  %v2142_v3 = vld [vmem:[%s2955_s7 + $0x18] sm:$0xff]  }
 0x240   : > { %v930_v5 = vmul.f32 %v1960_v4, %v2659_v43  ;;  %v948_v6 = vmul.f32 %v1960_v4, %v2661_v44  ;;  %v809_v10 = vpop.f32.mrb[15].mxu1  ;;  %1975 = vmatprep.subr.bf16.mxu0 %v2321_v37  ;;  %v2145_v4 = vld [vmem:[%s2955_s7 + $0x30] sm:$0xff]  }
 0x241   : > { %v963_v11 = vadd.f32 %v947_v2, %v927_v7  ;;  %v965_v9 = vadd.f32 %v949_v8, %v929_v1  ;;  %v928_v12 = vmul.f32 %v2666_v48, %v809_v10  ;;  %v950_v14 = vmul.f32 %v2668_v49, %v809_v10  ;;  %v2143_v7 = vld [vmem:[%s2955_s7 + $0x20] sm:$0xff]   ;;  %v2144_v8 = vld [vmem:[%s2955_s7 + $0x28] sm:$0xff]  }
 0x242   : > { %v1965_v28 = vpop.f32.mrb[0].mxu0 }
 0x243   : > { %v964_v15 = vadd.f32 %v948_v6, %v928_v12  ;;  %v966_v19 = vadd.f32 %v950_v14, %v930_v5  ;;  %1976 = vmatpush3.bf16.msra.mxu0 %v978_v63  ;;  %v933_v16 = vmul.f32 %v1965_v28, %v921_v38  ;;  %v951_v17 = vmul.f32 %v1965_v28, %v939_v39  ;;  %v855_v23 = vpop.f32.mrb[1].mxu0  ;;  %v2146_v5 = vld [vmem:[%s2955_s7 + $0x38] sm:$0xff]  }
 0x244   : > { %1989 = vmatprep.subr.bf16.mxu0 %v2321_v37  ;;  %v931_v29 = vmul.f32 %v2652_v40, %v855_v23  ;;  %v953_v31 = vmul.f32 %v2654_v41, %v855_v23  ;;  %v1966_v33 = vpop.f32.mrb[2].mxu0 }
 0x245   : > { %v979_v24 = vpack.c.bf16 %v964_v15, %v963_v11  ;;  %v980_v25 = vpack.c.bf16 %v966_v19, %v965_v9  ;;  %v1971_v26 = vpop.f32.mrb[16].mxu1  ;;  %v934_v45 = vmul.f32 %v1966_v33, %v2659_v43  ;;  %v952_v46 = vmul.f32 %v1966_v33, %v2661_v44  ;;  %v858_v47 = vpop.f32.mrb[3].mxu0 }
 0x246   : > { %v937_v35 = vmul.f32 %v1971_v26, %v921_v38  ;;  %v955_v36 = vmul.f32 %v1971_v26, %v939_v39  ;;  %v904_v42 = vpop.f32.mrb[17].mxu1  ;;  %1978 = vmatmul.mubr.msk.bf16.vlgmr.msra.gmra.mrb[4].mxu0 %vm990_vm4, %v2683_v13  ;;  %v967_v53 = vadd.f32 %v951_v17, %v931_v29  ;;  %v969_v54 = vadd.f32 %v953_v31, %v933_v16 }
 0x247   : > { %v935_v50 = vmul.f32 %v2652_v40, %v904_v42  ;;  %v957_v51 = vmul.f32 %v2654_v41, %v904_v42  ;;  %v1972_v52 = vpop.f32.mrb[18].mxu1  ;;  %1982 = vmatpush3.bf16.msra.mxu1 %v979_v24  ;;  %v932_v38 = vmul.f32 %v2666_v48, %v858_v47  ;;  %v954_v39 = vmul.f32 %v2668_v49, %v858_v47 }
 0x248   : > { %v907_v55 = vpop.f32.mrb[19].mxu1  ;;  %1983 = vmatprep.subr.bf16.mxu1 %v2321_v37  ;;  %v938_v58 = vmul.f32 %v1972_v52, %v2659_v43  ;;  %v956_v59 = vmul.f32 %v1972_v52, %v2661_v44  ;;  %1993 = vmatprep.mubr.msk.bf16.mxu0 %vm2322_vm3, %v2321_v37  ;;  %v2139_v44 = vld [vmem:[%s2955_s7] sm:$0xff]  }
 0x249   : > { %v971_v56 = vadd.f32 %v955_v36, %v935_v50  ;;  %v973_v57 = vadd.f32 %v957_v51, %v937_v35  ;;  %v968_v40 = vadd.f32 %v952_v46, %v932_v38  ;;  %v970_v41 = vadd.f32 %v954_v39, %v934_v45  ;;  %v2153_v38 = vld [vmem:[%s2957_s9 + $0x30] sm:$0xff]   ;;  %v2154_v39 = vld [vmem:[%s2957_s9 + $0x38] sm:$0xff]  }
 0x24a   : > { %v936_v60 = vmul.f32 %v2666_v48, %v907_v55  ;;  %v958_v61 = vmul.f32 %v2668_v49, %v907_v55  ;;  %v2140_v48 = vld [vmem:[%s2955_s7 + $0x8] sm:$0xff]   ;;  %v2141_v49 = vld [vmem:[%s2955_s7 + $0x10] sm:$0xff]   ;;  %v2155_v55 = vld [vmem:[%s2959_s11] sm:$0xff]  }
 0x24b   : > { %1984 = vmatpush3.bf16.msra.mxu1 %v980_v25  ;;  %v981_v62 = vpack.c.bf16 %v968_v40, %v967_v53  ;;  %v982_v63 = vpack.c.bf16 %v970_v41, %v969_v54  ;;  %v2151_v53 = vld [vmem:[%s2957_s9 + $0x20] sm:$0xff]   ;;  %v2152_v54 = vld [vmem:[%s2957_s9 + $0x28] sm:$0xff]  }
 0x24c   : > { %v972_v0 = vadd.f32 %v956_v59, %v936_v60  ;;  %v974_v1 = vadd.f32 %v958_v61, %v938_v58  ;;  %1997 = vmatprep.subr.bf16.mxu1 %v2321_v37  ;;  %v2158_v58 = vld [vmem:[%s2959_s11 + $0x18] sm:$0xff]   ;;  %v1848_v59 = vld [vmem:[%s2956_s8] ss:$0 sm:$0xff] }
 0x24d   : > { %1990 = vmatpush3.bf16.msra.mxu0 %v981_v62 }
 0x24e   : > { %v983_v43 = vpack.c.bf16 %v972_v0, %v971_v56  ;;  %v984_v2 = vpack.c.bf16 %v974_v1, %v973_v57  ;;  %1986 = vmatmul.mubr.msk.bf16.vlgmr.msra.gmra.mrb[20].mxu1 %vm990_vm4, %v2683_v13  ;;  %1991 = vmatprep.subr.bf16.mxu0 %v2321_v37  ;;  %v2156_v56 = vld [vmem:[%s2959_s11 + $0x8] sm:$0xff]   ;;  %v2157_v57 = vld [vmem:[%s2959_s11 + $0x10] sm:$0xff]  }
 0x24f   : > { %2001 = vmatprep.mubr.msk.bf16.mxu1 %vm2322_vm3, %v2321_v37 }
 0x250   : > { %1998 = vmatpush3.bf16.msra.mxu1 %v983_v43 }
 0x251   : > { %1999 = vmatprep.subr.bf16.mxu1 %v2321_v37  ;;  %1992 = vmatpush3.bf16.msra.mxu0 %v982_v63 }
 0x252   : > { %2005 = vmatprep.subr.bf16.mxu0 %v2139_v44 }
 0x254   : > { %2000 = vmatpush3.bf16.msra.mxu1 %v984_v2  ;;  %1994 = vmatmul.mubr.msk.bf16.vlgmr.msra.gmra.mrb[8].mxu0 %vm990_vm4, %v2683_v13 }
 0x255   : > { %2029 = vmatprep.subr.bf16.mxu1 %v2321_v37  ;;  %2006 = vmatpush3.bf16.msra.mxu0 %v2139_v44 }
 0x256   : > { %2007 = vmatprep.subr.bf16.mxu0 %v2140_v48 }
 0x257   : > { %2002 = vmatmul.mubr.msk.bf16.vlgmr.msra.gmra.mrb[24].mxu1 %vm990_vm4, %v2683_v13 }
 0x258   : > { %2045 = vmatprep.mubr.msk.bf16.mxu1 %vm2322_vm3, %v2321_v37 }
 0x259   : > { %2008 = vmatpush3.bf16.msra.mxu0 %v2140_v48 }
 0x25a   : > { %2009 = vmatprep.subr.bf16.mxu0 %v2141_v49 }
 0x25d   : > { %2010 = vmatpush3.bf16.msra.mxu0 %v2141_v49 }
 0x25e   : > { %2011 = vmatprep.subr.bf16.mxu0 %v2142_v3 }
 0x261   : > { %2012 = vmatpush3.bf16.msra.mxu0 %v2142_v3 }
 0x262   : > { %2013 = vmatprep.subr.bf16.mxu0 %v2143_v7 }
 0x265   : > { %2014 = vmatpush3.bf16.msra.mxu0 %v2143_v7 }
 0x266   : > { %2015 = vmatprep.subr.bf16.mxu0 %v2144_v8 }
 0x269   : > { %2016 = vmatpush3.bf16.msra.mxu0 %v2144_v8 }
 0x26a   : > { %2017 = vmatprep.subr.bf16.mxu0 %v2145_v4 }
 0x26d   : > { %2018 = vmatpush3.bf16.msra.mxu0 %v2145_v4 }
 0x26e   : > { %2019 = vmatprep.subr.bf16.mxu0 %v2146_v5 }
 0x271   : > { %2020 = vmatpush3.bf16.msra.mxu0 %v2146_v5 }
 0x272   : > { %2049 = vmatprep.subr.bf16.mxu0 %v2321_v37 }
 0x319   : > { %v1028_v6 = vpop.f32.mrb[4].mxu0 }
 0x31a   : > { %v1979_v10 = vpop.f32.mrb[5].mxu0  ;;  %v1158_v9 = vadd.f32 %v1028_v6, %v2607_v18 }
 0x31b   : > { %v1031_v11 = vpop.f32.mrb[6].mxu0 }
 0x31c   : > { %v1159_v12 = vadd.f32 %v1031_v11, %v2611_v21  ;;  %v1980_v14 = vpop.f32.mrb[7].mxu0 }
 0x31e   : > { %v1166_v13 = vpack.c.bf16 %v1159_v12, %v1158_v9  ;;  %v2744_v15 = vadd.f32 %v1159_v12, %v1158_v9 }
 0x320   : > { %2021 = vmatprep.mubr.bf16.mxu0 %v1166_v13 }
 0x321   : > { %v1069_v19 = vpop.f32.mrb[20].mxu1 }
 0x322   : > { %v1987_v28 = vpop.f32.mrb[21].mxu1  ;;  %v1160_v17 = vadd.f32 %v1069_v19, %v2613_v22 }
 0x323   : > { %v1072_v16 = vpop.f32.mrb[22].mxu1 }
 0x324   : > { %v1161_v23 = vadd.f32 %v1072_v16, %v2609_v20  ;;  %v1988_v24 = vpop.f32.mrb[23].mxu1 }
 0x326   : > { %v1167_v25 = vpack.c.bf16 %v1161_v23, %v1160_v17  ;;  %v2748_v26 = vadd.f32 %v1161_v23, %v1160_v17 }
 0x327   : > { %v1110_v29 = vpop.f32.mrb[8].mxu0 }
 0x328   : > { %2022 = vmatmul.mubr.bf16.vlgmr.msra.gmra.mrb[12].mxu0 %v1167_v25  ;;  %v1995_v18 = vpop.f32.mrb[9].mxu0  ;;  %v1162_v33 = vadd.f32 %v1110_v29, %v2626_v30  ;;  %v2147_v30 = vld [vmem:[%s2957_s9] sm:$0xff]  }
 0x329   : > { %v1113_v21 = vpop.f32.mrb[10].mxu0  ;;  %2030 = vmatpush3.bf16.msra.mxu1 %v2147_v30  ;;  %2050 = vmatpush3.bf16.msra.mxu0 %v2155_v55 }
 0x32a   : > { %v1151_v31 = vpop.f32.mrb[24].mxu1  ;;  %v1163_v35 = vadd.f32 %v1113_v21, %v2630_v34  ;;  %v1996_v42 = vpop.f32.mrb[11].mxu0  ;;  %2031 = vmatprep.subr.bf16.mxu1 %v2321_v37  ;;  %v2150_v34 = vld [vmem:[%s2957_s9 + $0x18] sm:$0xff]   ;;  %2051 = vmatprep.subr.bf16.mxu0 %v2321_v37 }
 0x32b   : > { %v2003_v36 = vpop.f32.mrb[25].mxu1  ;;  %v1164_v20 = vadd.f32 %v1151_v31, %v2624_v27  ;;  %v2148_v27 = vld [vmem:[%s2957_s9 + $0x8] sm:$0xff]  }
 0x32c   : > { %v1154_v45 = vpop.f32.mrb[26].mxu1  ;;  %v1168_v46 = vpack.c.bf16 %v1163_v35, %v1162_v33  ;;  %v2752_v22 = vadd.f32 %v1163_v35, %v1162_v33 }
 0x32d   : > { %v1165_v47 = vadd.f32 %v1154_v45, %v2628_v32  ;;  %v2004_v50 = vpop.f32.mrb[27].mxu1  ;;  %2032 = vmatpush3.bf16.msra.mxu1 %v2148_v27  ;;  %v2149_v32 = vld [vmem:[%s2957_s9 + $0x10] sm:$0xff]   ;;  %2052 = vmatpush3.bf16.msra.mxu0 %v2156_v56 }
 0x32e   : > { %2025 = vmatprep.mubr.bf16.mxu0 %v1168_v46  ;;  %2033 = vmatprep.subr.bf16.mxu1 %v2321_v37 }
 0x32f   : > { %v1169_v51 = vpack.c.bf16 %v1165_v47, %v1164_v20  ;;  %v2756_v52 = vadd.f32 %v1165_v47, %v1164_v20  ;;  %2053 = vmatprep.subr.bf16.mxu0 %v2321_v37 }
 0x331   : > { %2026 = vmatmul.mubr.bf16.gmra.mrb[16].mxu0 %v1169_v51  ;;  %2034 = vmatpush3.bf16.msra.mxu1 %v2149_v32 }
 0x332   : > { %2065 = vmatprep.mubr.msk.bf16.mxu0 %vm2322_vm3, %v2321_v37  ;;  %2035 = vmatprep.subr.bf16.mxu1 %v2321_v37 }
 0x333   : > { %2054 = vmatpush3.bf16.msra.mxu0 %v2157_v57 }
 0x334   : > { %2055 = vmatprep.subr.bf16.mxu0 %v2321_v37 }
 0x335   : > { %2036 = vmatpush3.bf16.msra.mxu1 %v2150_v34 }
 0x336   : > { %2037 = vmatprep.subr.bf16.mxu1 %v2321_v37 }
 0x337   : > { %2056 = vmatpush3.bf16.msra.mxu0 %v2158_v58 }
 0x338   : > { %2057 = vmatprep.subr.bf16.mxu0 %v2321_v37 }
 0x339   : > { %2038 = vmatpush3.bf16.msra.mxu1 %v2151_v53 }
 0x33a   : > { %2039 = vmatprep.subr.bf16.mxu1 %v2321_v37 }
 0x33d   : > { %2040 = vmatpush3.bf16.msra.mxu1 %v2152_v54 }
 0x33e   : > { %2041 = vmatprep.subr.bf16.mxu1 %v2321_v37 }
 0x341   : > { %2042 = vmatpush3.bf16.msra.mxu1 %v2153_v38 }
 0x342   : > { %2043 = vmatprep.subr.bf16.mxu1 %v2321_v37 }
 0x345   : > { %2044 = vmatpush3.bf16.msra.mxu1 %v2154_v39 }
 0x3fb   : > { %v2023_v40 = vpop.f32.mrb[12].mxu0 }
 0x3fc   : > { %v2810_v41 = vadd.f32 %v2023_v40, %v1848_v59  ;;  %v1275_v60 = vpop.f32.mrb[13].mxu0 }
 0x3fd   : > { %v2812_v61 = vadd.f32 %v1848_v59, %v1275_v60  ;;  %v2024_v62 = vpop.f32.mrb[14].mxu0 }
 0x3fe   : > { %v1308_v63 = vmul.f32 %v2810_v41, %v2810_v41  ;;  %v2816_v0 = vadd.f32 %v2024_v62, %v1848_v59  ;;  %v1278_v1 = vpop.f32.mrb[15].mxu0 }
 0x3ff   : > { %v1306_v43 = vmul.f32 %v2812_v61, %v2812_v61  ;;  %v2820_v2 = vadd.f32 %v1848_v59, %v1278_v1 }
 0x400   : > { %v1316_v44 = vmul.f32 %v1308_v63, %v2810_v41  ;;  %v1309_v48 = vmul.f32 %v2816_v0, %v2816_v0 }
 0x401   : > { %v1314_v49 = vmul.f32 %v1306_v43, %v2812_v61  ;;  %v1307_v3 = vmul.f32 %v2820_v2, %v2820_v2 }
 0x402   : > { %v1324_v7 = vmul.f32 0.044715, %v1316_v44  ;;  %v1317_v8 = vmul.f32 %v1309_v48, %v2816_v0 }
 0x403   : > { %v1322_v4 = vmul.f32 0.044715, %v1314_v49  ;;  %v1315_v5 = vmul.f32 %v1307_v3, %v2820_v2 }
 0x404   : > { %v1332_v6 = vadd.f32 %v1324_v7, %v2810_v41  ;;  %v1325_v10 = vmul.f32 0.044715, %v1317_v8  ;;  %v2027_v11 = vpop.f32.mrb[16].mxu0 }
 0x405   : > { %v1330_v9 = vadd.f32 %v1322_v4, %v2812_v61  ;;  %v1323_v12 = vmul.f32 0.044715, %v1315_v5  ;;  %v2832_v14 = vadd.f32 %v2027_v11, %v1848_v59  ;;  %v1291_v13 = vpop.f32.mrb[17].mxu0 }
 0x406   : > { %v1340_v19 = vmul.f32 0.7978846, %v1332_v6  ;;  %v1333_v28 = vadd.f32 %v1325_v10, %v2816_v0  ;;  %v2835_v16 = vadd.f32 %v1848_v59, %v1291_v13  ;;  %v2028_v17 = vpop.f32.mrb[18].mxu0 }
 0x407   : > { %v1338_v23 = vmul.f32 0.7978846, %v1330_v9  ;;  %v1331_v24 = vadd.f32 %v1323_v12, %v2820_v2  ;;  %v1312_v25 = vmul.f32 %v2832_v14, %v2832_v14  ;;  %v2840_v29 = vadd.f32 %v2028_v17, %v1848_v59  ;;  %v1294_v18 = vpop.f32.mrb[19].mxu0 }
 0x408   : > { %2171 = vtanh.f32 %v1340_v19  ;;  %v1341_v21 = vmul.f32 0.7978846, %v1333_v28  ;;  %v1310_v31 = vmul.f32 %v2835_v16, %v2835_v16  ;;  %v2844_v33 = vadd.f32 %v1848_v59, %v1294_v18 }
 0x409   : > { %2173 = vtanh.f32 %v1338_v23  ;;  %v1339_v35 = vmul.f32 0.7978846, %v1331_v24  ;;  %v1320_v36 = vmul.f32 %v1312_v25, %v2832_v14  ;;  %v1313_v42 = vmul.f32 %v2840_v29, %v2840_v29 }
 0x40a   : > { %2175 = vtanh.f32 %v1341_v21  ;;  %v1318_v45 = vmul.f32 %v1310_v31, %v2835_v16  ;;  %v1311_v46 = vmul.f32 %v2844_v33, %v2844_v33 }
 0x40b   : > { %2177 = vtanh.f32 %v1339_v35  ;;  %v1328_v20 = vmul.f32 0.044715, %v1320_v36  ;;  %v1321_v47 = vmul.f32 %v1313_v42, %v2840_v29 }
 0x40c   : > { %v1326_v50 = vmul.f32 0.044715, %v1318_v45  ;;  %v1319_v51 = vmul.f32 %v1311_v46, %v2844_v33 }
 0x40d   : > { %v1336_v30 = vadd.f32 %v1328_v20, %v2832_v14  ;;  %v1329_v27 = vmul.f32 0.044715, %v1321_v47 }
 0x40e   : > { %v1334_v32 = vadd.f32 %v1326_v50, %v2835_v16  ;;  %v1327_v34 = vmul.f32 0.044715, %v1319_v51 }
 0x40f   : > { %v1344_v53 = vmul.f32 0.7978846, %v1336_v30  ;;  %v1337_v54 = vadd.f32 %v1329_v27, %v2840_v29 }
 0x410   : > { %v1342_v38 = vmul.f32 0.7978846, %v1334_v32  ;;  %v1335_v39 = vadd.f32 %v1327_v34, %v2844_v33 }
 0x411   : > { %2179 = vtanh.f32 %v1344_v53  ;;  %v1345_v55 = vmul.f32 0.7978846, %v1337_v54 }
 0x412   : > { %v2172_v56 = vpop.eup %2171  ;;  %2181 = vtanh.f32 %v1342_v38  ;;  %v1343_v57 = vmul.f32 0.7978846, %v1335_v39 }
 0x413   : > { %v2174_v58 = vpop.eup %2173  ;;  %v1356_v59 = vadd.f32 1.0, %v2172_v56  ;;  %2183 = vtanh.f32 %v1345_v55 }
 0x414   : > { %v2176_v40 = vpop.eup %2175  ;;  %v1354_v60 = vadd.f32 1.0, %v2174_v58  ;;  %2185 = vtanh.f32 %v1343_v57 }
 0x415   : > { %v2178_v62 = vpop.eup %2177  ;;  %v1364_v63 = vmul.f32 0.5, %v1356_v59  ;;  %v1357_v1 = vadd.f32 1.0, %v2176_v40 }
 0x416   : > { %v1362_v43 = vmul.f32 0.5, %v1354_v60  ;;  %v1355_v44 = vadd.f32 1.0, %v2178_v62 }
 0x417   : > { %v1365_v48 = vmul.f32 0.5, %v1357_v1  ;;  %v1372_v3 = vmul.f32 %v1364_v63, %v2810_v41 }
 0x418   : > { %v1363_v49 = vmul.f32 0.5, %v1355_v44  ;;  %v1370_v8 = vmul.f32 %v1362_v43, %v2812_v61 }
 0x419   : > { %v1373_v7 = vmul.f32 %v1365_v48, %v2816_v0 }
 0x41a   : > { %v1371_v4 = vmul.f32 %v1363_v49, %v2820_v2 }
 0x41b   : > { %v2180_v5 = vpop.eup %2179  ;;  %v1417_v6 = vadd.f32 %v1373_v7, %v1372_v3 }
 0x41c   : > { %v2182_v10 = vpop.eup %2181  ;;  %v1410_v11 = vadd.f32 %v1371_v4, %v1370_v8  ;;  %v1360_v9 = vadd.f32 1.0, %v2180_v5 }
 0x41d   : > { %v2184_v12 = vpop.eup %2183  ;;  %v1418_v13 = vrot.slane %v1417_v6, 4  ;;  %v1358_v19 = vadd.f32 1.0, %v2182_v10  ;;  %v2160_v10 = vld [vmem:[%s2959_s11 + $0x28] sm:$0xff]  }
 0x41e   : > { %v2186_v28 = vpop.eup %2185  ;;  %v1411_v17 = vrot.slane %v1410_v11, 4  ;;  %v1368_v23 = vmul.f32 0.5, %v1360_v9  ;;  %v1361_v24 = vadd.f32 1.0, %v2184_v12  ;;  %v2162_v9 = vld [vmem:[%s2959_s11 + $0x38] sm:$0xff]   ;;  %v1379_v12 = vrot.slane %v2744_v15, 4 }
 0x41f   : > { %v1419_v25 = vadd.f32 %v1418_v13, %v1417_v6  ;;  %v1366_v41 = vmul.f32 0.5, %v1358_v19  ;;  %v1359_v18 = vadd.f32 1.0, %v2186_v28  ;;  %v2159_v6 = vld [vmem:[%s2959_s11 + $0x20] sm:$0xff]   ;;  %v1386_v13 = vrot.slane %v2748_v26, 4 }
 0x420   : > { %v1412_v0 = vadd.f32 %v1411_v17, %v1410_v11  ;;  %v1369_v21 = vmul.f32 0.5, %v1361_v24  ;;  %v1376_v35 = vmul.f32 %v1368_v23, %v2832_v14  ;;  %2058 = vmatpush3.bf16.msra.mxu0 %v2159_v6  ;;  %v2161_v11 = vld [vmem:[%s2959_s11 + $0x30] sm:$0xff]   ;;  %v1393_v19 = vrot.slane %v2752_v22, 4 }
 0x421   : > { %v1420_v61 = vrot.slane %v1419_v25, 2  ;;  %v1367_v31 = vmul.f32 0.5, %v1359_v18  ;;  %v1374_v45 = vmul.f32 %v1366_v41, %v2835_v16  ;;  %2059 = vmatprep.subr.bf16.mxu0 %v2321_v37  ;;  %v1400_v28 = vrot.slane %v2756_v52, 4 }
 0x422   : > { %v1413_v2 = vrot.slane %v1412_v0, 2  ;;  %v1377_v36 = vmul.f32 %v1369_v21, %v2840_v29  ;;  %v1380_v17 = vadd.f32 %v1379_v12, %v2744_v15  ;;  %v1387_v23 = vadd.f32 %v1386_v13, %v2748_v26 }
 0x423   : > { %v1421_v42 = vadd.f32 %v1420_v61, %v1419_v25  ;;  %v1375_v46 = vmul.f32 %v1367_v31, %v2844_v33  ;;  %v1394_v24 = vadd.f32 %v1393_v19, %v2752_v22  ;;  %v1401_v25 = vadd.f32 %v1400_v28, %v2756_v52 }
 0x424   : > { %v1414_v20 = vadd.f32 %v1413_v2, %v1412_v0  ;;  %v1431_v47 = vadd.f32 %v1377_v36, %v1376_v35  ;;  %2060 = vmatpush3.bf16.msra.mxu0 %v2160_v10  ;;  %v1381_v41 = vrot.slane %v1380_v17, 2  ;;  %v1388_v18 = vrot.slane %v1387_v23, 2 }
 0x425   : > { %v1422_v50 = vrot.slane %v1421_v42, 1  ;;  %v1424_v51 = vadd.f32 %v1375_v46, %v1374_v45  ;;  %2061 = vmatprep.subr.bf16.mxu0 %v2321_v37  ;;  %v1402_v0 = vrot.slane %v1401_v25, 2 }
 0x426   : > { %v1415_v30 = vrot.slane %v1414_v20, 1  ;;  %v1432_v27 = vrot.slane %v1431_v47, 4  ;;  %v1382_v21 = vadd.f32 %v1381_v41, %v1380_v17  ;;  %v1389_v61 = vadd.f32 %v1388_v18, %v1387_v23 }
 0x427   : > { %v1423_v32 = vadd.f32 %v1422_v50, %v1421_v42  ;;  %v1425_v34 = vrot.slane %v1424_v51, 4  ;;  %v1403_v2 = vadd.f32 %v1402_v0, %v1401_v25 }
 0x428   : > { %v1416_v53 = vadd.f32 %v1415_v30, %v1414_v20  ;;  %v1433_v54 = vadd.f32 %v1432_v27, %v1431_v47  ;;  %2062 = vmatpush3.bf16.msra.mxu0 %v2161_v11  ;;  %v1383_v35 = vrot.slane %v1382_v21, 1  ;;  %v1390_v36 = vrot.slane %v1389_v61, 1  ;;  %v1865_v30 = vld [vmem:[%s2958_s10] ss:$0 sm:$0xff] }
 0x429   : > { %v1439_v38 = vmul.f32 0.0625, %v1423_v32  ;;  %v1426_v39 = vadd.f32 %v1425_v34, %v1424_v51  ;;  %2063 = vmatprep.subr.bf16.mxu0 %v2321_v37  ;;  %v1395_v37 = vrot.slane %v1394_v24, 2  ;;  %v1404_v45 = vrot.slane %v1403_v2, 1 }
 0x42a   : > { %v1438_v14 = vmul.f32 0.0625, %v1416_v53  ;;  %v1434_v55 = vrot.slane %v1433_v54, 2  ;;  %v1384_v46 = vadd.f32 %v1383_v35, %v1382_v21  ;;  %v1391_v15 = vadd.f32 %v1390_v36, %v1389_v61 }
 0x42b   : > { %v1427_v29 = vrot.slane %v1426_v39, 2  ;;  %v1443_v56 = vpack.c.bf16 %v1439_v38, %v1439_v38  ;;  %v1396_v31 = vadd.f32 %v1395_v37, %v1394_v24  ;;  %v1405_v26 = vadd.f32 %v1404_v45, %v1403_v2 }
 0x42c   : > { %v1435_v57 = vadd.f32 %v1434_v55, %v1433_v54  ;;  %v1442_v16 = vpack.c.bf16 %v1438_v14, %v1438_v14  ;;  %2064 = vmatpush3.bf16.msra.mxu0 %v2162_v9  ;;  %v1406_v47 = vmul.f32 0.0625, %v1384_v46  ;;  %v1407_v22 = vmul.f32 0.0625, %v1391_v15 }
 0x42d   : > { %v1428_v58 = vadd.f32 %v1427_v29, %v1426_v39  ;;  %v1467_v33 = vunpack.c.l.b16 %v1443_v56  ;;  %v1397_v42 = vrot.slane %v1396_v31, 1  ;;  %v1409_v52 = vmul.f32 0.0625, %v1405_v26 }
 0x42e   : > { %v1436_v59 = vrot.slane %v1435_v57, 1  ;;  %v1466_v40 = vunpack.c.l.b16 %v1442_v16 }
 0x42f   : > { %v1429_v60 = vrot.slane %v1428_v58, 1  ;;  %v1398_v20 = vadd.f32 %v1397_v42, %v1396_v31 }
 0x430   : > { %v1437_v62 = vadd.f32 %v1436_v59, %v1435_v57  ;;  %v1471_v63 = vsel %vm1470_vm5, %v1467_v33, %v1466_v40 }
 0x431   : > { %v1430_v1 = vadd.f32 %v1429_v60, %v1428_v58  ;;  %v1408_v50 = vmul.f32 0.0625, %v1398_v20 }
 0x432   : > { %v1441_v43 = vmul.f32 0.0625, %v1437_v62 }
 0x433   : > { %v1440_v44 = vmul.f32 0.0625, %v1430_v1 }
 0x434   : > { %v1445_v48 = vpack.c.bf16 %v1441_v43, %v1441_v43 }
 0x435   : > { %v1444_v49 = vpack.c.bf16 %v1440_v44, %v1440_v44 }
 0x436   : > { %v1469_v7 = vunpack.c.l.b16 %v1445_v48 }
 0x437   : > { %v1468_v3 = vunpack.c.l.b16 %v1444_v49 }
 0x439   : > { %v1473_v8 = vsel %vm1472_vm6, %v1468_v3, %v1471_v63 }
 0x43a   : > { %v1475_v4 = vsel %vm1474_vm7, %v1469_v7, %v1473_v8 }
 0x43b   : > { %v1476_v5 = vpack.c.b16 %v1475_v4, %v1475_v4 }
 0x43d   : > { %2046 = vmatmul.mubr.bf16.vlgmr.msra.gmra.mrb[28].mxu1 %v1476_v5  ;;  %v1866_v5 = vld [vmem:[%s2960_s12] ss:$0 sm:$0xff] }
 0x510   : > { %v1560_v51 = vpop.f32.mrb[28].mxu1 }
 0x511   : > { %v1567_v27 = vrot.slane %v1560_v51, 1  ;;  %v1568_v32 = vrot.slane %v1560_v51, 2  ;;  %v1569_v34 = vrot.slane %v1560_v51, 3  ;;  %v1574_v53 = vadd.f32 %v1560_v51, %v1406_v47  ;;  %v2047_v54 = vpop.f32.mrb[29].mxu1 }
 0x512   : > { %v1563_v38 = vpop.f32.mrb[30].mxu1 }
 0x513   : > { %v1575_v39 = vadd.f32 %v1567_v27, %v1407_v22  ;;  %v1576_v14 = vadd.f32 %v1568_v32, %v1408_v50  ;;  %v1577_v55 = vadd.f32 %v1569_v34, %v1409_v52  ;;  %v1585_v29 = vadd.f32 %v1865_v30, %v1574_v53  ;;  %v2048_v56 = vpop.f32.mrb[31].mxu1 }
 0x515   : > { %v1586_v57 = vadd.f32 %v1865_v30, %v1575_v39  ;;  %v1587_v16 = vadd.f32 %v1865_v30, %v1576_v14  ;;  %v1588_v58 = vadd.f32 %v1865_v30, %v1577_v55  ;;  %v1589_v33 = vpack.c.bf16 %v1585_v29, %v1585_v29 }
 0x517   : > { %v1590_v59 = vpack.c.bf16 %v1586_v57, %v1586_v57  ;;  %v1591_v40 = vpack.c.bf16 %v1587_v16, %v1587_v16  ;;  %v1592_v60 = vpack.c.bf16 %v1588_v58, %v1588_v58  ;;  %v1620_v43 = vunpack.c.l.b16 %v1589_v33 }
 0x519   : > { %v1621_v62 = vunpack.c.l.b16 %v1590_v59  ;;  %v1622_v63 = vunpack.c.l.b16 %v1591_v40  ;;  %v1623_v1 = vunpack.c.l.b16 %v1592_v60 }
 0x51b   : > { %v1624_v44 = vrot.slane %v1621_v62, 7  ;;  %v1626_v48 = vrot.slane %v1622_v63, 6  ;;  %v1628_v3 = vrot.slane %v1623_v1, 5 }
 0x51d   : > { %v1625_v49 = vsel %vm1470_vm5, %v1624_v44, %v1620_v43 }
 0x51e   : > { %v1627_v7 = vsel %vm1472_vm6, %v1626_v48, %v1625_v49 }
 0x51f   : > { %v1629_v8 = vsel %vm1474_vm7, %v1628_v3, %v1627_v7 }
 0x520   : > { %v1630_v4 = vpack.c.b16 %v1629_v8, %v1629_v8 }
 0x522   : > { %2066 = vmatmul.mubr.bf16.vlgmr.msra.gmra.mrb[20].mxu0 %v1630_v4 }
 0x5f5   : > { %v1714_v6 = vpop.f32.mrb[20].mxu0 }
 0x5f6   : > { %v1715_v10 = vadd.f32 %v1866_v5, %v1714_v6  ;;  %v2067_v11 = vpop.f32.mrb[21].mxu0 }
 0x5f7   : > { %v1717_v9 = vpop.f32.mrb[22].mxu0 }
 0x5f8   : > { %1720 = vst [vmem:[%s466_s15] sm:$0xf] %v1715_v10  ;;  %v2068_v12 = vpop.f32.mrb[23].mxu0 }
 0x5f9   : > { %2256 = shalt.err (!%p2253_p11)
}
 0x5fa   : > { %s2257_s28 = scalar_lea.hbm %s2906_s21, 64  ;;  %s2261_s30 = scalar_lea.hbm %s2988_s16, 128 }
 0x5fb   : > { %p2258_p13 = scmp.ne.s32.totalorder %s2906_s21, %s2257_s28  ;;  %p2262_p6 = scmp.lt.u32.totalorder %s2906_s21, %s2988_s16 }
 0x5fc   : > { %p2263_p9 = scmp.lt.u32.totalorder %s2261_s30, %s2257_s28  ;;  %p2265_p12 = scmp.lt.u32.totalorder %s2257_s28, %s2906_s21 }
 0x5fd   : > { %p2259_p0 = pnand %p2258_p13, %p2989_p1 }
 0x5fe   : > { %p2264_p10 = por %p2263_p9, %p2262_p6 }
 0x5ff   : > { %p2260_p5 = pneg %p2259_p0 }
 0x600   : > { %p2266_p2 = por %p2265_p12, %p2264_p10 }
 0x602   : > { %p2267_p3 = pnand %p2266_p2, %p2260_p5 }
 0x604   : > { %2270 = shalt.err (!%p2267_p3)
}
 0x605   : > { %2078 = dma.vmem_to_hbm [thread:$0]  (%p2989_p1), %s2908_s14, 64, %s2906_s21, %s1722_s24  }
 0x606 PF: > { %s2990_s17 = sld [smem:[#allocation13_spill]]  ;;  %s2991_s19 = sld [smem:[#allocation11_spill]] }
 0x607   : > { %s2992_s29 = sld [smem:[#allocation16_spill]] }
 0x60c   : > { %p2095_p4 = scmp.ge.s32.totalorder %s2990_s17, 2  ;;  %s1747_s22 = sand.u32 1, %s2991_s19  }
 0x60d   : > { %p2993_p7 = scmp.ne.s32.totalorder %s2992_s29, 0  ;;  %s1748_s13 = scalar_lea.sflag [#allocation4], %s1747_s22 }
 0x60f   : > { %p2088_p8 = pnand %p2095_p4, %p2993_p7 }
 0x611   : > { %2296 = dma.done.wait (!%p2088_p8), %s1748_s13, 64  }
 0x612   : > { %2298 = vsyncadd (!%p2088_p8), %s1748_s13, 4294967232  ;;  %s2994_s28 = sld [smem:[#allocation14_spill]]  ;;  %s2995_s27 = sld [smem:[#allocation12_spill]] }
 0x613   : > { %s2996_s23 = sld [smem:[#allocation15_spill]]  ;;  %s2997_s25 = smov %s2305_s26 }
 0x618   : > { %p25_p11 = scmp.ge.s32.totalorder %s2994_s28, 4   ;;  %s2998_s26 = smov %s2995_s27 }
 0x619   : > { %s2999_s27 = smov %s2996_s23 }
 0x61a   :  { %27 = sbr.rel (!%p25_p11) target bundleno = 7 (0x7), region = 116 }
 0x621   :  { %1753 = vsyncpa [#allocation3], 1 }
 0x622   :  { %1755 = vsyncpa [#allocation3 + $0x1], 1 }
 0x623   :  { %1756 = vsyncpa [#allocation6], 1 }
 0x624   :  { %1757 = vsyncpa [#allocation4], 1 }
 0x625   :  { %1759 = vsyncpa [#allocation4 + $0x1], 1 }

</bundles_post_ra>
